<compile_context>
chip_gen: v6e
topology: v6e:2x2x1
jax: 0.10.0
libtpu: 0.0.40
codegen_flags: <defaults>
</compile_context>

<pallas_src>
import math

import jax
import jax.numpy as jnp
import numpy as np
from jax.experimental import pallas as pl
from jax.experimental.pallas import tpu as pltpu

C1, C2, C3 = 128, 64, 32          # encoder conv channel widths
K1, K2, K3 = 11, 5, 3             # kernel sizes
P1, P2, P3 = 5, 2, 1              # 'same' paddings
PD = 4                            # halo rows per side (>= max(P2,P3); 2*PD % 8 == 0)
XCOLS = 32                        # conv1 im2col width: 2*K1 taps + 1 indicator + pad

_ROLL_MODE = None


def _get_roll_mode():
    """Probe pltpu.roll's sublane-rotation direction once (and that it lowers);
    fall back to slice+concat row shifts if it does not."""
    global _ROLL_MODE
    if _ROLL_MODE is not None:
        return _ROLL_MODE
    rows = 128
    mode = "concat"
    try:
        def probe(x_ref, o_ref):
            o_ref[...] = pltpu.roll(x_ref[...], rows - 1, axis=0)

        x = jnp.tile(jnp.arange(rows, dtype=jnp.float32)[:, None], (1, 128))
        out = pl.pallas_call(
            probe, out_shape=jax.ShapeDtypeStruct((rows, 128), jnp.float32))(x)
        v = float(jax.device_get(out[0, 0]))
        if v == 1.0:
            mode = "roll"       # np.roll convention: out[i] = x[(i - shift) % rows]
        elif v == float(rows - 1):
            mode = "roll_neg"   # opposite convention
    except Exception:
        mode = "concat"
    _ROLL_MODE = mode
    return mode


def _choose_tb(B, Np):
    """Batch elements per grid step: target ~768 rows per step (feedback:
    512-1024), TB a multiple of 8 so the (TB, N*F) output block stays
    (8,128)-tileable, >=2 grid steps when the batch allows (megacore / 2 TCs),
    otherwise run the whole (small) batch in a single full-array block."""
    tb = max(8, (768 // Np) // 8 * 8)
    if B >= 2 * tb:
        return tb
    return max(1, B)


def _make_kernel(N, F, Np, shift_mode):
    NF = N * F

    def shift_rows(v, d):
        # result row i = v[(i + d) % rows]
        if d == 0:
            return v
        rows = v.shape[0]
        if shift_mode == "roll":
            return pltpu.roll(v, (-d) % rows, axis=0)
        if shift_mode == "roll_neg":
            return pltpu.roll(v, d % rows, axis=0)
        dd = d % rows
        return jnp.concatenate([v[dd:], v[:dd]], axis=0)

    def kernel(x_ref, w1c_ref, w2_ref, b2_ref, w3_ref, b3_ref,
               wl_ref, hb_ref, omask_ref, rmask_ref, out_ref):
        TB = x_ref.shape[0]
        R = TB * Np
        cdt = w1c_ref.dtype

        # ---- conv1 + 1x1 shortcut + folded biases: ONE MXU matmul
        # (R, 32) @ (32, 128+32).  Halo rows of x are all-zero (incl. the
        # indicator column), so h0 is exactly 0 there.
        xi = x_ref[...].reshape(R, XCOLS)          # layout-free: Np % 8 == 0
        h0 = jnp.dot(xi, w1c_ref[...], preferred_element_type=jnp.float32)
        h1 = jnp.maximum(h0[:, :C1], 0.0)          # (R, 128) conv1+BN1+ReLU
        sc = h0[:, C1:]                            # (R, 32)  shortcut+BN_sc

        # ---- conv2 (k=5): per-tap dots on the UNSHIFTED h1; the tap offsets
        # are applied to the narrower (R, 64) products with an XLU row rotate
        # (no im2col slab, no sublane-misaligned window copies).
        h1c = h1.astype(cdt)
        acc2 = jnp.zeros((R, C2), jnp.float32)
        for t in range(K2):
            prod = jnp.dot(h1c, w2_ref[t], preferred_element_type=jnp.float32)
            acc2 = acc2 + shift_rows(prod, t - P2)
        h2 = jnp.maximum(acc2 + b2_ref[...], 0.0)  # (R, 64)
        # Re-zero halo rows (garbage/bias there); conv3's 'same' padding must
        # see zeros.
        h2 = (h2.reshape(TB, Np, C2) * rmask_ref[...]).reshape(R, C2)

        # ---- conv3 (k=3): per-tap (R,64)@(64,32) dots at native width.
        h2c = h2.astype(cdt)
        acc3 = jnp.zeros((R, C3), jnp.float32)
        for t in range(K3):
            prod = jnp.dot(h2c, w3_ref[t], preferred_element_type=jnp.float32)
            acc3 = acc3 + shift_rows(prod, t - P3)
        out1 = acc3 + b3_ref[...]                  # (R, 32) conv3+BN3

        # ---- residual add, ReLU, TimeDistributed(Linear(32, 2G)).  BN1d(N)
        # scale is folded into the position-tiled weight; Linear bias + BN
        # shift into hb.  Lane-dense output: keep each row's own F columns and
        # sublane-sum the N positions into one (N*F)-lane row per batch elem.
        z = jnp.maximum(out1 + sc, 0.0).astype(cdt)
        y = jnp.dot(z, wl_ref[...], preferred_element_type=jnp.float32)  # (R, NF)
        y3 = y.reshape(TB, Np, NF) * omask_ref[...]
        out_ref[...] = jnp.sum(y3, axis=1) + hb_ref[...]

    return kernel


def encoder_forward(x_cl, kparams, N, G):
    """x_cl: (B, N, 2) channels-last input.  Returns (B, 2, N*G)."""
    (w1c, w2k, b2, w3k, b3, wl_big, hb_flat, out_mask, row_mask) = kparams
    B = x_cl.shape[0]
    F = 2 * G
    NF = N * F
    assert N % 8 == 0, "N must be a multiple of 8 for layout-free row merges"
    Np = N + 2 * PD
    cdt = w1c.dtype

    TB = _choose_tb(B, Np)
    Bp = ((B + TB - 1) // TB) * TB
    n_steps = Bp // TB

    # Host-side conv1 im2col (layout plumbing, not compute hoisting): column
    # 2*t+c holds the tap-t / channel-c input sample, column 22 is the interior
    # indicator that carries the folded biases, rest zero.  Halo rows (PD each
    # side per batch element) stay all-zero.
    xp = jnp.pad(x_cl, ((0, Bp - B), (P1, P1), (0, 0)))                # (Bp, N+10, 2)
    taps = jnp.concatenate([xp[:, t:t + N, :] for t in range(K1)], axis=-1)  # (Bp,N,22)
    ind = jnp.ones((Bp, N, 1), jnp.float32)
    zpad = jnp.zeros((Bp, N, XCOLS - 2 * K1 - 1), jnp.float32)
    x_core = jnp.concatenate([taps, ind, zpad], axis=-1)               # (Bp, N, 32)
    x_im = jnp.pad(x_core, ((0, 0), (PD, PD), (0, 0))).astype(cdt)     # (Bp, Np, 32)

    shift_mode = _get_roll_mode()
    kernel = _make_kernel(N, F, Np, shift_mode)

    def full(arr):
        nd = arr.ndim
        return pl.BlockSpec(arr.shape, lambda b, _nd=nd: (0,) * _nd)

    y = pl.pallas_call(
        kernel,
        out_shape=jax.ShapeDtypeStruct((Bp, NF), jnp.float32),
        grid_spec=pltpu.PrefetchScalarGridSpec(
            num_scalar_prefetch=0,
            grid=(n_steps,),
            in_specs=[
                pl.BlockSpec((TB, Np, XCOLS), lambda b: (b, 0, 0)),
                full(w1c), full(w2k), full(b2), full(w3k), full(b3),
                full(wl_big), full(hb_flat), full(out_mask), full(row_mask),
            ],
            out_specs=pl.BlockSpec((TB, NF), lambda b: (b, 0)),
        ),
        compiler_params=pltpu.CompilerParams(
            dimension_semantics=("parallel",),
            # Per-step footprint is only a few MiB; 32 MiB is safe on v7x too.
            vmem_limit_bytes=32 * 1024 * 1024),
    )(x_im, w1c, w2k, b2, w3k, b3, wl_big, hb_flat, out_mask, row_mask)

    # PyTorch: (B, N, 2G) contiguous -> reshape(B, 2, N*G)
    return y[:B].reshape(B, 2, N * G)


def init_params(key, N, G):
    """Deterministic synthetic per-layer parameters.  Conv bias + eval-mode BN
    are folded into per-channel (scale, shift)."""
    F = 2 * G
    EPS = 1e-5
    keys = iter(jax.random.split(key, 32))
    nk = lambda: next(keys)

    def conv_block(cin, cout, ksz):
        # weight stored as (K, Cin, Cout) == transpose of torch (Cout, Cin, K)
        w = jax.random.normal(nk(), (ksz, cin, cout), jnp.float32) / math.sqrt(cin * ksz)
        b = 0.1 * jax.random.normal(nk(), (cout,), jnp.float32)
        gamma = 1.0 + 0.1 * jax.random.normal(nk(), (cout,), jnp.float32)
        beta = 0.1 * jax.random.normal(nk(), (cout,), jnp.float32)
        mean = 0.1 * jax.random.normal(nk(), (cout,), jnp.float32)
        var = 1.0 + 0.1 * jnp.abs(jax.random.normal(nk(), (cout,), jnp.float32))
        scale = gamma / jnp.sqrt(var + EPS)
        shift = beta - mean * scale + b * scale
        return w, scale.reshape(1, cout), shift.reshape(1, cout)

    w1, s1, h1s = conv_block(2, C1, K1)
    w2, s2, h2s = conv_block(C1, C2, K2)
    w3, s3, h3s = conv_block(C2, C3, K3)
    ws3, ssc, hsc = conv_block(2, C3, 1)
    ws = ws3[0]                                            # (2, 32) 1x1 conv

    wl = (jax.random.normal(nk(), (F, C3), jnp.float32) / math.sqrt(C3)).T  # (32, 2G)
    bl = (0.1 * jax.random.normal(nk(), (F,), jnp.float32)).reshape(1, F)

    gamma_n = 1.0 + 0.1 * jax.random.normal(nk(), (N,), jnp.float32)
    beta_n = 0.1 * jax.random.normal(nk(), (N,), jnp.float32)
    mean_n = 0.1 * jax.random.normal(nk(), (N,), jnp.float32)
    var_n = 1.0 + 0.1 * jnp.abs(jax.random.normal(nk(), (N,), jnp.float32))
    scale_n = gamma_n / jnp.sqrt(var_n + EPS)
    sn = scale_n.reshape(N, 1)
    hn = (beta_n - mean_n * scale_n).reshape(N, 1)

    return (w1, s1, h1s, w2, s2, h2s, w3, s3, h3s, ws, ssc, hsc, wl, bl, sn, hn)


def pack_kernel_params(params, N, G, compute_dtype=jnp.float32):
    """Fold BN scales/shifts into packed weights; build the lane-dense output
    gather masks.  compute_dtype=bf16 casts MXU operands for v6e/v7x."""
    (w1, s1, h1s, w2, s2, h2s, w3, s3, h3s,
     ws, ssc, hsc, wl, bl, sn, hn) = params
    F = 2 * G
    NF = N * F
    Np = N + 2 * PD
    cdt = compute_dtype

    # conv1 + 1x1 shortcut as one (32, 160) im2col weight:
    #   rows 0..21 : conv1 taps (row 2*t+c), BN1 scale folded
    #   rows 10,11 : additionally the shortcut 1x1 weights (cols 128:)
    #   row  22    : folded biases (ride the interior-indicator column)
    w1c = jnp.zeros((XCOLS, C1 + C3), jnp.float32)
    w1c = w1c.at[:2 * K1, :C1].set((w1 * s1).reshape(2 * K1, C1))
    w1c = w1c.at[2 * P1:2 * P1 + 2, C1:].set(ws * ssc)
    w1c = w1c.at[2 * K1, :].set(jnp.concatenate([h1s, hsc], axis=-1)[0])

    w2k = w2 * s2                      # (5, 128, 64), BN2 scale folded
    b2 = h2s                           # (1, 64)
    w3k = w3 * s3                      # (3, 64, 32), BN3 scale folded
    b3 = h3s                           # (1, 32)

    # TimeDistributed Linear, tiled per position, with the per-position BN1d(N)
    # scale folded into the columns -> lane-dense (32, N*F) weight; Linear bias
    # + BN1d(N) shift folded into one (1, N*F) vector.
    sn_flat = jnp.repeat(sn[:, 0], F)                     # (NF,)
    wl_big = jnp.tile(wl, (1, N)) * sn_flat[None, :]      # (32, NF)
    hb_flat = (bl * sn + hn).reshape(1, NF)               # (1, NF)

    # Masks (f32): interior-row indicator and the position -> lane-block
    # selection mask for the lane-dense output gather.
    rm = np.zeros((Np, 1), np.float32)
    rm[PD:PD + N, 0] = 1.0
    om = np.zeros((Np, NF), np.float32)
    for n in range(N):
        om[PD + n, n * F:(n + 1) * F] = 1.0

    return (w1c.astype(cdt), w2k.astype(cdt), b2, w3k.astype(cdt), b3,
            wl_big.astype(cdt), hb_flat, jnp.asarray(om), jnp.asarray(rm))


def reference_forward(x_cl, params, N, G):
    """Pure-JAX reference (channels-last), same folded per-layer parameters."""
    (w1, s1, h1s, w2, s2, h2s, w3, s3, h3s,
     ws, ssc, hsc, wl, bl, sn, hn) = params

    def conv(h, w, pad):
        K = w.shape[0]
        L = h.shape[1]
        hp = jnp.pad(h, ((0, 0), (pad, pad), (0, 0)))
        out = jnp.zeros((h.shape[0], L, w.shape[2]), jnp.float32)
        for t in range(K):
            out = out + jnp.einsum('blc,cd->bld', hp[:, t:t + L, :], w[t])
        return out

    h = jnp.maximum(conv(x_cl, w1, P1) * s1 + h1s, 0.0)
    h = jnp.maximum(conv(h, w2, P2) * s2 + h2s, 0.0)
    out1 = conv(h, w3, P3) * s3 + h3s
    sc = jnp.einsum('blc,cd->bld', x_cl, ws) * ssc + hsc
    y = jnp.maximum(out1 + sc, 0.0)
    y = jnp.einsum('blc,cd->bld', y, wl) + bl
    y = y * sn + hn
    return y.reshape(x_cl.shape[0], 2, -1)


if __name__ == "__main__":
    B, N, G = 2, 16, 4                 # Encoder(N=16, G=4); x: (B, 2, N)
    key = jax.random.PRNGKey(0)
    kx, kp = jax.random.split(key)
    x = jax.random.normal(kx, (B, 2, N), jnp.float32)   # PyTorch NCL input
    params = init_params(kp, N, G)
    x_cl = jnp.transpose(x, (0, 2, 1))                  # (B, N, 2) channels-last

    ref = reference_forward(x_cl, params, N, G)

    # f32 MXU-operand path: exact parity with the f32 reference.
    kp_f32 = pack_kernel_params(params, N, G, jnp.float32)
    out_f32 = jax.block_until_ready(encoder_forward(x_cl, kp_f32, N, G))
    assert out_f32.shape == (B, 2, N * G), out_f32.shape
    np.testing.assert_allclose(np.asarray(out_f32), np.asarray(ref),
                               atol=5e-4, rtol=5e-4)

    # bf16 MXU-operand path (v6e/v7x recommendation): looser tolerance.
    kp_bf16 = pack_kernel_params(params, N, G, jnp.bfloat16)
    out_bf16 = jax.block_until_ready(encoder_forward(x_cl, kp_bf16, N, G))
    np.testing.assert_allclose(np.asarray(out_bf16), np.asarray(ref),
                               atol=5e-2, rtol=5e-2)

    print("KERNEL_OK")
</pallas_src>

<mosaic_0001>
module attributes {stable_mosaic.version = 11 : i64} {
  func.func @probe(%arg0: memref<128x128xf32, #tpu.memory_space<vmem>>, %arg1: memref<128x128xf32, #tpu.memory_space<vmem>>) attributes {dimension_semantics = [], scalar_prefetch = 0 : i64, scratch_operands = 0 : i64, tpu.core_type = #tpu.core_type<tc>} {
    %c0 = arith.constant 0 : index
    %c0_0 = arith.constant 0 : index
    %0 = vector.load %arg0[%c0, %c0_0] : memref<128x128xf32, #tpu.memory_space<vmem>>, vector<128x128xf32>
    %c127_i32 = arith.constant 127 : i32
    %1 = tpu.dynamic_rotate %0 by %c127_i32 dim 0 : vector<128x128xf32>, i32 -> vector<128x128xf32>
    %c0_1 = arith.constant 0 : index
    %c0_2 = arith.constant 0 : index
    %2 = vector.load %arg1[%c0_1, %c0_2] : memref<128x128xf32, #tpu.memory_space<vmem>>, vector<128x128xf32>
    tpu.vector_store %arg1[%c0_1, %c0_2], %1 {strides = array<i32>} : memref<128x128xf32, #tpu.memory_space<vmem>>, vector<128x128xf32>,
    return
  }
}

module attributes {stable_mosaic.version = 11 : i64} {
  func.func @kernel(%arg0: i32, %arg1: memref<2x24x32xf32, #tpu.memory_space<vmem>>, %arg2: memref<32x160xf32, #tpu.memory_space<vmem>>, %arg3: memref<5x128x64xf32, #tpu.memory_space<vmem>>, %arg4: memref<1x64xf32, #tpu.memory_space<vmem>>, %arg5: memref<3x64x32xf32, #tpu.memory_space<vmem>>, %arg6: memref<1x32xf32, #tpu.memory_space<vmem>>, %arg7: memref<32x128xf32, #tpu.memory_space<vmem>>, %arg8: memref<1x128xf32, #tpu.memory_space<vmem>>, %arg9: memref<24x128xf32, #tpu.memory_space<vmem>>, %arg10: memref<24x1xf32, #tpu.memory_space<vmem>>, %arg11: memref<2x128xf32, #tpu.memory_space<vmem>>) attributes {dimension_semantics = [#tpu.dimension_semantics<parallel>], iteration_bounds = array<i64: 1>, scalar_prefetch = 0 : i64, scratch_operands = 0 : i64, tpu.core_type = #tpu.core_type<tc>, window_params = [{transform_indices = @transform_0, window_bounds = array<i64: 2, 24, 32>}, {pipeline_mode = #tpu.pipeline_mode<synchronous>, transform_indices = @transform_1, window_bounds = array<i64: 32, 160>}, {pipeline_mode = #tpu.pipeline_mode<synchronous>, transform_indices = @transform_2, window_bounds = array<i64: 5, 128, 64>}, {pipeline_mode = #tpu.pipeline_mode<synchronous>, transform_indices = @transform_3, window_bounds = array<i64: 1, 64>}, {pipeline_mode = #tpu.pipeline_mode<synchronous>, transform_indices = @transform_4, window_bounds = array<i64: 3, 64, 32>}, {pipeline_mode = #tpu.pipeline_mode<synchronous>, transform_indices = @transform_5, window_bounds = array<i64: 1, 32>}, {pipeline_mode = #tpu.pipeline_mode<synchronous>, transform_indices = @transform_6, window_bounds = array<i64: 32, 128>}, {pipeline_mode = #tpu.pipeline_mode<synchronous>, transform_indices = @transform_7, window_bounds = array<i64: 1, 128>}, {pipeline_mode = #tpu.pipeline_mode<synchronous>, transform_indices = @transform_8, window_bounds = array<i64: 24, 128>}, {pipeline_mode = #tpu.pipeline_mode<synchronous>, transform_indices = @transform_9, window_bounds = array<i64: 24, 1>}, {transform_indices = @transform_10, window_bounds = array<i64: 2, 128>}]} {
    %c0 = arith.constant 0 : index
    %c0_0 = arith.constant 0 : index
    %c0_1 = arith.constant 0 : index
    %0 = vector.load %arg1[%c0, %c0_0, %c0_1] : memref<2x24x32xf32, #tpu.memory_space<vmem>>, vector<2x24x32xf32>
    %1 = vector.shape_cast %0 : vector<2x24x32xf32> to vector<48x32xf32>
    %c0_2 = arith.constant 0 : index
    %c0_3 = arith.constant 0 : index
    %2 = vector.load %arg2[%c0_2, %c0_3] : memref<32x160xf32, #tpu.memory_space<vmem>>, vector<32x160xf32>
    %cst = arith.constant dense<0.000000e+00> : vector<48x160xf32>
    %3 = tpu.matmul %1, %2, %cst {dimension_numbers = #tpu.dot_dimension_numbers<[1], [0], [0], [1], [0, 0, 1, 1], [], []>} : vector<48x32xf32>, vector<32x160xf32>, vector<48x160xf32> -> vector<48x160xf32>
    %4 = vector.extract_strided_slice %3 {offsets = [0, 0], sizes = [48, 128], strides = [1, 1]} : vector<48x160xf32> to vector<48x128xf32>
    %cst_4 = arith.constant 0.000000e+00 : f32
    %5 = vector.broadcast %cst_4 : f32 to vector<48x128xf32>
    %6 = arith.maximumf %4, %5 : vector<48x128xf32>
    %7 = vector.extract_strided_slice %3 {offsets = [0, 128], sizes = [48, 32], strides = [1, 1]} : vector<48x160xf32> to vector<48x32xf32>
    %cst_5 = arith.constant 0.000000e+00 : f32
    %8 = vector.broadcast %cst_5 : f32 to vector<48x64xf32>
    %c0_6 = arith.constant 0 : index
    %c0_7 = arith.constant 0 : index
    %c0_8 = arith.constant 0 : index
    %9 = vector.load %arg3[%c0_6, %c0_7, %c0_8] : memref<5x128x64xf32, #tpu.memory_space<vmem>>, vector<1x128x64xf32>
    %10 = vector.shape_cast %9 : vector<1x128x64xf32> to vector<128x64xf32>
    %cst_9 = arith.constant dense<0.000000e+00> : vector<48x64xf32>
    %11 = tpu.matmul %6, %10, %cst_9 {dimension_numbers = #tpu.dot_dimension_numbers<[1], [0], [0], [1], [0, 0, 1, 1], [], []>} : vector<48x128xf32>, vector<128x64xf32>, vector<48x64xf32> -> vector<48x64xf32>
    %12 = vector.extract_strided_slice %11 {offsets = [46, 0], sizes = [2, 64], strides = [1, 1]} : vector<48x64xf32> to vector<2x64xf32>
    %13 = vector.extract_strided_slice %11 {offsets = [0, 0], sizes = [46, 64], strides = [1, 1]} : vector<48x64xf32> to vector<46x64xf32>
    %14 = tpu.concatenate %12, %13 in 0 : vector<2x64xf32>, vector<46x64xf32> -> vector<48x64xf32>
    %15 = arith.addf %8, %14 : vector<48x64xf32>
    %c1 = arith.constant 1 : index
    %c0_10 = arith.constant 0 : index
    %c0_11 = arith.constant 0 : index
    %16 = vector.load %arg3[%c1, %c0_10, %c0_11] : memref<5x128x64xf32, #tpu.memory_space<vmem>>, vector<1x128x64xf32>
    %17 = vector.shape_cast %16 : vector<1x128x64xf32> to vector<128x64xf32>
    %cst_12 = arith.constant dense<0.000000e+00> : vector<48x64xf32>
    %18 = tpu.matmul %6, %17, %cst_12 {dimension_numbers = #tpu.dot_dimension_numbers<[1], [0], [0], [1], [0, 0, 1, 1], [], []>} : vector<48x128xf32>, vector<128x64xf32>, vector<48x64xf32> -> vector<48x64xf32>
    %19 = vector.extract_strided_slice %18 {offsets = [47, 0], sizes = [1, 64], strides = [1, 1]} : vector<48x64xf32> to vector<1x64xf32>
    %20 = vector.extract_strided_slice %18 {offsets = [0, 0], sizes = [47, 64], strides = [1, 1]} : vector<48x64xf32> to vector<47x64xf32>
    %21 = tpu.concatenate %19, %20 in 0 : vector<1x64xf32>, vector<47x64xf32> -> vector<48x64xf32>
    %22 = arith.addf %15, %21 : vector<48x64xf32>
    %c2 = arith.constant 2 : index
    %c0_13 = arith.constant 0 : index
    %c0_14 = arith.constant 0 : index
    %23 = vector.load %arg3[%c2, %c0_13, %c0_14] : memref<5x128x64xf32, #tpu.memory_space<vmem>>, vector<1x128x64xf32>
    %24 = vector.shape_cast %23 : vector<1x128x64xf32> to vector<128x64xf32>
    %cst_15 = arith.constant dense<0.000000e+00> : vector<48x64xf32>
    %25 = tpu.matmul %6, %24, %cst_15 {dimension_numbers = #tpu.dot_dimension_numbers<[1], [0], [0], [1], [0, 0, 1, 1], [], []>} : vector<48x128xf32>, vector<128x64xf32>, vector<48x64xf32> -> vector<48x64xf32>
    %26 = arith.addf %22, %25 : vector<48x64xf32>
    %c3 = arith.constant 3 : index
    %c0_16 = arith.constant 0 : index
    %c0_17 = arith.constant 0 : index
    %27 = vector.load %arg3[%c3, %c0_16, %c0_17] : memref<5x128x64xf32, #tpu.memory_space<vmem>>, vector<1x128x64xf32>
    %28 = vector.shape_cast %27 : vector<1x128x64xf32> to vector<128x64xf32>
    %cst_18 = arith.constant dense<0.000000e+00> : vector<48x64xf32>
    %29 = tpu.matmul %6, %28, %cst_18 {dimension_numbers = #tpu.dot_dimension_numbers<[1], [0], [0], [1], [0, 0, 1, 1], [], []>} : vector<48x128xf32>, vector<128x64xf32>, vector<48x64xf32> -> vector<48x64xf32>
    %30 = vector.extract_strided_slice %29 {offsets = [1, 0], sizes = [47, 64], strides = [1, 1]} : vector<48x64xf32> to vector<47x64xf32>
    %31 = vector.extract_strided_slice %29 {offsets = [0, 0], sizes = [1, 64], strides = [1, 1]} : vector<48x64xf32> to vector<1x64xf32>
    %32 = tpu.concatenate %30, %31 in 0 : vector<47x64xf32>, vector<1x64xf32> -> vector<48x64xf32>
    %33 = arith.addf %26, %32 : vector<48x64xf32>
    %c4 = arith.constant 4 : index
    %c0_19 = arith.constant 0 : index
    %c0_20 = arith.constant 0 : index
    %34 = vector.load %arg3[%c4, %c0_19, %c0_20] : memref<5x128x64xf32, #tpu.memory_space<vmem>>, vector<1x128x64xf32>
    %35 = vector.shape_cast %34 : vector<1x128x64xf32> to vector<128x64xf32>
    %cst_21 = arith.constant dense<0.000000e+00> : vector<48x64xf32>
    %36 = tpu.matmul %6, %35, %cst_21 {dimension_numbers = #tpu.dot_dimension_numbers<[1], [0], [0], [1], [0, 0, 1, 1], [], []>} : vector<48x128xf32>, vector<128x64xf32>, vector<48x64xf32> -> vector<48x64xf32>
    %37 = vector.extract_strided_slice %36 {offsets = [2, 0], sizes = [46, 64], strides = [1, 1]} : vector<48x64xf32> to vector<46x64xf32>
    %38 = vector.extract_strided_slice %36 {offsets = [0, 0], sizes = [2, 64], strides = [1, 1]} : vector<48x64xf32> to vector<2x64xf32>
    %39 = tpu.concatenate %37, %38 in 0 : vector<46x64xf32>, vector<2x64xf32> -> vector<48x64xf32>
    %40 = arith.addf %33, %39 : vector<48x64xf32>
    %c0_22 = arith.constant 0 : index
    %c0_23 = arith.constant 0 : index
    %41 = vector.load %arg4[%c0_22, %c0_23] : memref<1x64xf32, #tpu.memory_space<vmem>>, vector<1x64xf32>
    %42 = vector.broadcast %41 : vector<1x64xf32> to vector<48x64xf32>
    %43 = arith.addf %40, %42 : vector<48x64xf32>
    %cst_24 = arith.constant 0.000000e+00 : f32
    %44 = vector.broadcast %cst_24 : f32 to vector<48x64xf32>
    %45 = arith.maximumf %43, %44 : vector<48x64xf32>
    %46 = vector.shape_cast %45 : vector<48x64xf32> to vector<2x24x64xf32>
    %c0_25 = arith.constant 0 : index
    %c0_26 = arith.constant 0 : index
    %47 = vector.load %arg10[%c0_25, %c0_26] : memref<24x1xf32, #tpu.memory_space<vmem>>, vector<24x1xf32>
    %48 = vector.shape_cast %47 : vector<24x1xf32> to vector<1x24x1xf32>
    %49 = vector.broadcast %48 : vector<1x24x1xf32> to vector<2x24x64xf32>
    %50 = arith.mulf %46, %49 : vector<2x24x64xf32>
    %51 = vector.shape_cast %50 : vector<2x24x64xf32> to vector<48x64xf32>
    %cst_27 = arith.constant 0.000000e+00 : f32
    %52 = vector.broadcast %cst_27 : f32 to vector<48x32xf32>
    %c0_28 = arith.constant 0 : index
    %c0_29 = arith.constant 0 : index
    %c0_30 = arith.constant 0 : index
    %53 = vector.load %arg5[%c0_28, %c0_29, %c0_30] : memref<3x64x32xf32, #tpu.memory_space<vmem>>, vector<1x64x32xf32>
    %54 = vector.shape_cast %53 : vector<1x64x32xf32> to vector<64x32xf32>
    %cst_31 = arith.constant dense<0.000000e+00> : vector<48x32xf32>
    %55 = tpu.matmul %51, %54, %cst_31 {dimension_numbers = #tpu.dot_dimension_numbers<[1], [0], [0], [1], [0, 0, 1, 1], [], []>} : vector<48x64xf32>, vector<64x32xf32>, vector<48x32xf32> -> vector<48x32xf32>
    %56 = vector.extract_strided_slice %55 {offsets = [47, 0], sizes = [1, 32], strides = [1, 1]} : vector<48x32xf32> to vector<1x32xf32>
    %57 = vector.extract_strided_slice %55 {offsets = [0, 0], sizes = [47, 32], strides = [1, 1]} : vector<48x32xf32> to vector<47x32xf32>
    %58 = tpu.concatenate %56, %57 in 0 : vector<1x32xf32>, vector<47x32xf32> -> vector<48x32xf32>
    %59 = arith.addf %52, %58 : vector<48x32xf32>
    %c1_32 = arith.constant 1 : index
    %c0_33 = arith.constant 0 : index
    %c0_34 = arith.constant 0 : index
    %60 = vector.load %arg5[%c1_32, %c0_33, %c0_34] : memref<3x64x32xf32, #tpu.memory_space<vmem>>, vector<1x64x32xf32>
    %61 = vector.shape_cast %60 : vector<1x64x32xf32> to vector<64x32xf32>
    %cst_35 = arith.constant dense<0.000000e+00> : vector<48x32xf32>
    %62 = tpu.matmul %51, %61, %cst_35 {dimension_numbers = #tpu.dot_dimension_numbers<[1], [0], [0], [1], [0, 0, 1, 1], [], []>} : vector<48x64xf32>, vector<64x32xf32>, vector<48x32xf32> -> vector<48x32xf32>
    %63 = arith.addf %59, %62 : vector<48x32xf32>
    %c2_36 = arith.constant 2 : index
    %c0_37 = arith.constant 0 : index
    %c0_38 = arith.constant 0 : index
    %64 = vector.load %arg5[%c2_36, %c0_37, %c0_38] : memref<3x64x32xf32, #tpu.memory_space<vmem>>, vector<1x64x32xf32>
    %65 = vector.shape_cast %64 : vector<1x64x32xf32> to vector<64x32xf32>
    %cst_39 = arith.constant dense<0.000000e+00> : vector<48x32xf32>
    %66 = tpu.matmul %51, %65, %cst_39 {dimension_numbers = #tpu.dot_dimension_numbers<[1], [0], [0], [1], [0, 0, 1, 1], [], []>} : vector<48x64xf32>, vector<64x32xf32>, vector<48x32xf32> -> vector<48x32xf32>
    %67 = vector.extract_strided_slice %66 {offsets = [1, 0], sizes = [47, 32], strides = [1, 1]} : vector<48x32xf32> to vector<47x32xf32>
    %68 = vector.extract_strided_slice %66 {offsets = [0, 0], sizes = [1, 32], strides = [1, 1]} : vector<48x32xf32> to vector<1x32xf32>
    %69 = tpu.concatenate %67, %68 in 0 : vector<47x32xf32>, vector<1x32xf32> -> vector<48x32xf32>
    %70 = arith.addf %63, %69 : vector<48x32xf32>
    %c0_40 = arith.constant 0 : index
    %c0_41 = arith.constant 0 : index
    %71 = vector.load %arg6[%c0_40, %c0_41] : memref<1x32xf32, #tpu.memory_space<vmem>>, vector<1x32xf32>
    %72 = vector.broadcast %71 : vector<1x32xf32> to vector<48x32xf32>
    %73 = arith.addf %70, %72 : vector<48x32xf32>
    %74 = arith.addf %73, %7 : vector<48x32xf32>
    %cst_42 = arith.constant 0.000000e+00 : f32
    %75 = vector.broadcast %cst_42 : f32 to vector<48x32xf32>
    %76 = arith.maximumf %74, %75 : vector<48x32xf32>
    %c0_43 = arith.constant 0 : index
    %c0_44 = arith.constant 0 : index
    %77 = vector.load %arg7[%c0_43, %c0_44] : memref<32x128xf32, #tpu.memory_space<vmem>>, vector<32x128xf32>
    %cst_45 = arith.constant dense<0.000000e+00> : vector<48x128xf32>
    %78 = tpu.matmul %76, %77, %cst_45 {dimension_numbers = #tpu.dot_dimension_numbers<[1], [0], [0], [1], [0, 0, 1, 1], [], []>} : vector<48x32xf32>, vector<32x128xf32>, vector<48x128xf32> -> vector<48x128xf32>
    %79 = vector.shape_cast %78 : vector<48x128xf32> to vector<2x24x128xf32>
    %c0_46 = arith.constant 0 : index
    %c0_47 = arith.constant 0 : index
    %80 = vector.load %arg9[%c0_46, %c0_47] : memref<24x128xf32, #tpu.memory_space<vmem>>, vector<24x128xf32>
    %81 = vector.shape_cast %80 : vector<24x128xf32> to vector<1x24x128xf32>
    %82 = vector.broadcast %81 : vector<1x24x128xf32> to vector<2x24x128xf32>
    %83 = arith.mulf %79, %82 : vector<2x24x128xf32>
    %cst_48 = arith.constant dense<0.000000e+00> : vector<2x128xf32>
    %84 = vector.multi_reduction <add>, %83, %cst_48 [1] : vector<2x24x128xf32> to vector<2x128xf32>
    %c0_49 = arith.constant 0 : index
    %c0_50 = arith.constant 0 : index
    %85 = vector.load %arg8[%c0_49, %c0_50] : memref<1x128xf32, #tpu.memory_space<vmem>>, vector<1x128xf32>
    %86 = vector.broadcast %85 : vector<1x128xf32> to vector<2x128xf32>
    %87 = arith.addf %84, %86 : vector<2x128xf32>
    %c0_51 = arith.constant 0 : index
    %c0_52 = arith.constant 0 : index
    %88 = vector.load %arg11[%c0_51, %c0_52] : memref<2x128xf32, #tpu.memory_space<vmem>>, vector<2x128xf32>
    tpu.vector_store %arg11[%c0_51, %c0_52], %87 {strides = array<i32>} : memref<2x128xf32, #tpu.memory_space<vmem>>, vector<2x128xf32>,
    return
  }
  func.func @transform_0(%arg0: i32) -> (i32, i32, i32) {
    %c0_i32 = arith.constant 0 : i32
    %c0_i32_0 = arith.constant 0 : i32
    %c0_i32_1 = arith.constant 0 : i32
    return %arg0, %c0_i32, %c0_i32_0 : i32, i32, i32
  }
  func.func @transform_1(%arg0: i32) -> (i32, i32) {
    %c0_i32 = arith.constant 0 : i32
    %c0_i32_0 = arith.constant 0 : i32
    %c0_i32_1 = arith.constant 0 : i32
    return %c0_i32, %c0_i32_0 : i32, i32
  }
  func.func @transform_2(%arg0: i32) -> (i32, i32, i32) {
    %c0_i32 = arith.constant 0 : i32
    %c0_i32_0 = arith.constant 0 : i32
    %c0_i32_1 = arith.constant 0 : i32
    %c0_i32_2 = arith.constant 0 : i32
    return %c0_i32, %c0_i32_0, %c0_i32_1 : i32, i32, i32
  }
  func.func @transform_3(%arg0: i32) -> (i32, i32) {
    %c0_i32 = arith.constant 0 : i32
    %c0_i32_0 = arith.constant 0 : i32
    %c0_i32_1 = arith.constant 0 : i32
    return %c0_i32, %c0_i32_0 : i32, i32
  }
  func.func @transform_4(%arg0: i32) -> (i32, i32, i32) {
    %c0_i32 = arith.constant 0 : i32
    %c0_i32_0 = arith.constant 0 : i32
    %c0_i32_1 = arith.constant 0 : i32
    %c0_i32_2 = arith.constant 0 : i32
    return %c0_i32, %c0_i32_0, %c0_i32_1 : i32, i32, i32
  }
  func.func @transform_5(%arg0: i32) -> (i32, i32) {
    %c0_i32 = arith.constant 0 : i32
    %c0_i32_0 = arith.constant 0 : i32
    %c0_i32_1 = arith.constant 0 : i32
    return %c0_i32, %c0_i32_0 : i32, i32
  }
  func.func @transform_6(%arg0: i32) -> (i32, i32) {
    %c0_i32 = arith.constant 0 : i32
    %c0_i32_0 = arith.constant 0 : i32
    %c0_i32_1 = arith.constant 0 : i32
    return %c0_i32, %c0_i32_0 : i32, i32
  }
  func.func @transform_7(%arg0: i32) -> (i32, i32) {
    %c0_i32 = arith.constant 0 : i32
    %c0_i32_0 = arith.constant 0 : i32
    %c0_i32_1 = arith.constant 0 : i32
    return %c0_i32, %c0_i32_0 : i32, i32
  }
  func.func @transform_8(%arg0: i32) -> (i32, i32) {
    %c0_i32 = arith.constant 0 : i32
    %c0_i32_0 = arith.constant 0 : i32
    %c0_i32_1 = arith.constant 0 : i32
    return %c0_i32, %c0_i32_0 : i32, i32
  }
  func.func @transform_9(%arg0: i32) -> (i32, i32) {
    %c0_i32 = arith.constant 0 : i32
    %c0_i32_0 = arith.constant 0 : i32
    %c0_i32_1 = arith.constant 0 : i32
    return %c0_i32, %c0_i32_0 : i32, i32
  }
  func.func @transform_10(%arg0: i32) -> (i32, i32) {
    %c0_i32 = arith.constant 0 : i32
    %c0_i32_0 = arith.constant 0 : i32
    return %arg0, %c0_i32 : i32, i32
  }
}

</mosaic_0001>

<bundles_post_ra>
// kernel: tpu_custom_call.1
= control target key start
LH: loop header
LB: loop body
LE: loop exit
PB: predicated region body
PF: predicated region fallthrough
CT: control target
= control target key end

     0   :  { %6 = vsyncpa [#allocation3], 0  ;;  %s219_s0 = inlined_call_operand.hbm [shape: f32[128,128], index: 0, kind: input, shape index: {}]   ;;  %s220_s1 = inlined_call_operand.hbm [shape: f32[128,128], index: 1, kind: output, shape index: {}]  }
   0x1   :  { %7 = vsyncpa [#allocation4], 0  ;;  %s155_s6 = smov [#allocation2]  }
   0x2   :  { %s13_s7 = sshll.u32 %s155_s6, 4  ;;  %s14_s7 = int_to_ptr.vmem [resolvable:$true] %s13_s7 }
   0x3   :  { %s119_s8 = scalar_lea.vmem %s14_s7, 2048  ;;  %p124_p1 = scmp.lt.s32.totalorder %s14_s7, %s14_s7 }
   0x4   :  { %p120_p0 = scmp.ne.s32.totalorder %s14_s7, %s119_s8  ;;  %p125_p2 = scmp.lt.s32.totalorder %s119_s8, %s119_s8 }
   0x6   :  { %p126_p3 = por %p125_p2, %p124_p1 }
   0x8   :  { %p127_p4 = pnand %p126_p3, %p120_p0 }
   0xa   :  { %130 = shalt.err (!%p127_p4)
}
   0xb   :  { %s156_s9 = smov 128   ;;  %s157_s10 = smov 8  }
   0xc   :  { %19 = dma.hbm_to_vmem [thread:$0]  %s219_s0, 2048, %s14_s7, [#allocation3], %s156_s9, %s156_s9, %s157_s10  }
   0xd   :  { %151 = dma.done.wait [#allocation3], 2048  }
   0xe   :  { %152 = vsyncadd [#allocation3], 4294965248  ;;  %v55_v0 = vlaneseq  ;;  %v177_v2 = vld [vmem:[#allocation2] sm:$0xff]  ;;  %v24_v3 = vld [vmem:[#allocation2 + $0x8] sm:$0xff]  ;;  %s158_s0 = smov [#allocation5]  }
   0xf   :  { %v25_v4 = vld [vmem:[#allocation2 + $0x10] sm:$0xff]  ;;  %v39_v5 = vrot.slane %v177_v2, 1  ;;  %v40_v6 = vrot.slane %v24_v3, 1  ;;  %v26_v8 = vld [vmem:[#allocation2 + $0x18] sm:$0xff]  ;;  %v27_v9 = vld [vmem:[#allocation2 + $0x20] sm:$0xff]  ;;  %s95_s13 = sshll.u32 %s158_s0, 4  ;;  %s96_s13 = int_to_ptr.vmem [resolvable:$true] %s95_s13 }
  0x10   :  { %v175_v1 = vshrl.u32 %v55_v0, 7  ;;  %v41_v7 = vrot.slane %v25_v4, 1  ;;  %v28_v10 = vld [vmem:[#allocation2 + $0x28] sm:$0xff]  ;;  %v42_v11 = vrot.slane %v26_v8, 1  ;;  %v43_v12 = vrot.slane %v27_v9, 1  ;;  %v29_v14 = vld [vmem:[#allocation2 + $0x30] sm:$0xff]  ;;  %p136_p6 = scmp.lt.s32.totalorder %s96_s13, %s96_s13 }
  0x11   :  { %v44_v13 = vrot.slane %v28_v10, 1  ;;  %v30_v15 = vld [vmem:[#allocation2 + $0x38] sm:$0xff]  ;;  %v31_v16 = vld [vmem:[#allocation2 + $0x40] sm:$0xff]  ;;  %v45_v19 = vrot.slane %v29_v14, 1  ;;  %v32_v21 = vld [vmem:[#allocation2 + $0x48] sm:$0xff]  ;;  %s131_s14 = scalar_lea.vmem %s96_s13, 2048 }
  0x12   :  { %vm57_vm0 = vcmp.lt.s32.totalorder %v175_v1, 7  ;;  %v46_v20 = vrot.slane %v30_v15, 1  ;;  %v33_v22 = vld [vmem:[#allocation2 + $0x50] sm:$0xff]  ;;  %v34_v23 = vld [vmem:[#allocation2 + $0x58] sm:$0xff]  ;;  %v47_v27 = vrot.slane %v31_v16, 1  ;;  %v35_v28 = vld [vmem:[#allocation2 + $0x60] sm:$0xff]  ;;  %p132_p5 = scmp.ne.s32.totalorder %s96_s13, %s131_s14  ;;  %p137_p7 = scmp.lt.s32.totalorder %s131_s14, %s131_s14 }
  0x13   :  { %v72_v17 = vsel %vm57_vm0, %v39_v5, %v40_v6  ;;  %v71_v18 = vsel %vm57_vm0, %v40_v6, %v41_v7  ;;  %v70_v24 = vsel %vm57_vm0, %v41_v7, %v42_v11  ;;  %v69_v25 = vsel %vm57_vm0, %v42_v11, %v43_v12  ;;  %v36_v29 = vld [vmem:[#allocation2 + $0x68] sm:$0xff]  ;;  %v37_v30 = vld [vmem:[#allocation2 + $0x70] sm:$0xff]  ;;  %v38_v35 = vld [vmem:[#allocation2 + $0x78] sm:$0xff] }
  0x14   :  { %74 = vst [vmem:[#allocation5] sm:$0xff] %v72_v17  ;;  %75 = vst [vmem:[#allocation5 + $0x8] sm:$0xff] %v71_v18  ;;  %v68_v26 = vsel %vm57_vm0, %v43_v12, %v44_v13  ;;  %v67_v31 = vsel %vm57_vm0, %v44_v13, %v45_v19  ;;  %v66_v32 = vsel %vm57_vm0, %v45_v19, %v46_v20  ;;  %v48_v33 = vrot.slane %v32_v21, 1  ;;  %p138_p8 = por %p137_p7, %p136_p6 }
  0x15   :  { %76 = vst [vmem:[#allocation5 + $0x10] sm:$0xff] %v70_v24  ;;  %77 = vst [vmem:[#allocation5 + $0x18] sm:$0xff] %v69_v25  ;;  %v49_v34 = vrot.slane %v33_v22, 1  ;;  %v65_v36 = vsel %vm57_vm0, %v46_v20, %v47_v27  ;;  %v50_v37 = vrot.slane %v34_v23, 1  ;;  %v51_v38 = vrot.slane %v35_v28, 1 }
  0x16   :  { %78 = vst [vmem:[#allocation5 + $0x20] sm:$0xff] %v68_v26  ;;  %79 = vst [vmem:[#allocation5 + $0x28] sm:$0xff] %v67_v31  ;;  %v52_v39 = vrot.slane %v36_v29, 1  ;;  %v64_v40 = vsel %vm57_vm0, %v47_v27, %v48_v33  ;;  %v53_v42 = vrot.slane %v37_v30, 1  ;;  %v54_v43 = vrot.slane %v38_v35, 1  ;;  %p139_p9 = pnand %p138_p8, %p132_p5 }
  0x17   :  { %80 = vst [vmem:[#allocation5 + $0x30] sm:$0xff] %v66_v32  ;;  %81 = vst [vmem:[#allocation5 + $0x38] sm:$0xff] %v65_v36  ;;  %v63_v41 = vsel %vm57_vm0, %v48_v33, %v49_v34  ;;  %v62_v44 = vsel %vm57_vm0, %v49_v34, %v50_v37  ;;  %v61_v45 = vsel %vm57_vm0, %v50_v37, %v51_v38 }
  0x18   :  { %82 = vst [vmem:[#allocation5 + $0x40] sm:$0xff] %v64_v40  ;;  %83 = vst [vmem:[#allocation5 + $0x48] sm:$0xff] %v63_v41  ;;  %v60_v46 = vsel %vm57_vm0, %v51_v38, %v52_v39  ;;  %v59_v47 = vsel %vm57_vm0, %v52_v39, %v53_v42  ;;  %v58_v48 = vsel %vm57_vm0, %v53_v42, %v54_v43 }
  0x19   :  { %84 = vst [vmem:[#allocation5 + $0x50] sm:$0xff] %v62_v44  ;;  %85 = vst [vmem:[#allocation5 + $0x58] sm:$0xff] %v61_v45  ;;  %v73_v49 = vsel %vm57_vm0, %v54_v43, %v39_v5 }
  0x1a   :  { %86 = vst [vmem:[#allocation5 + $0x60] sm:$0xff] %v60_v46  ;;  %87 = vst [vmem:[#allocation5 + $0x68] sm:$0xff] %v59_v47 }
  0x1b   :  { %88 = vst [vmem:[#allocation5 + $0x70] sm:$0xff] %v58_v48  ;;  %89 = vst [vmem:[#allocation5 + $0x78] sm:$0xff] %v73_v49 }
  0x1c   :  { %142 = shalt.err (!%p139_p9)
}
  0x1d   :  { %101 = dma.vmem_to_hbm [thread:$0]  %s96_s13, 2048, %s220_s1, [#allocation4], %s156_s9, %s156_s9, %s157_s10  }
  0x1e   :  { %153 = dma.done.wait [#allocation4], 2048  }
  0x1f   :  { %154 = vsyncadd [#allocation4], 4294965248 }
  0x20   :  { %105 = vsyncpa [#allocation3], 1 }
  0x21   :  { %106 = vsyncpa [#allocation4], 1 }

// kernel: tpu_custom_call.1
= control target key start
LH: loop header
LB: loop body
LE: loop exit
PB: predicated region body
PF: predicated region fallthrough
CT: control target
= control target key end

     0   :  { %v2106_v4 = vmov 0.0   ;;  %vm50_vm0 = vcmask 261120   ;;  %s2705_s0 = inlined_call_operand.vmem [shape: f32[2,24,32], index: 0, kind: input, shape index: {}]   ;;  %s2706_s1 = inlined_call_operand.vmem [shape: f32[32,160], index: 1, kind: input, shape index: {}]   ;;  %s2707_s2 = inlined_call_operand.vmem [shape: f32[5,128,64], index: 2, kind: input, shape index: {}]   ;;  %s2708_s3 = inlined_call_operand.vmem [shape: f32[1,64], index: 3, kind: input, shape index: {}]   ;;  %s2709_s4 = inlined_call_operand.vmem [shape: f32[3,64,32], index: 4, kind: input, shape index: {}]   ;;  %s2710_s5 = inlined_call_operand.vmem [shape: f32[1,32], index: 5, kind: input, shape index: {}]   ;;  %s2711_s6 = inlined_call_operand.vmem [shape: f32[32,128], index: 6, kind: input, shape index: {}]   ;;  %s2712_s7 = inlined_call_operand.vmem [shape: f32[1,128], index: 7, kind: input, shape index: {}]   ;;  %s2713_s8 = inlined_call_operand.vmem [shape: f32[24,128], index: 8, kind: input, shape index: {}]   ;;  %s2714_s9 = inlined_call_operand.vmem [shape: f32[24,1], index: 9, kind: input, shape index: {}]   ;;  %s2715_s10 = inlined_call_operand.hbm [shape: f32[2,128], index: 10, kind: output, shape index: {}]  }
   0x1   :  { %v49_v0 = vld [vmem:[%s2706_s1 + $0x38] sm:$0xff]  ;;  %v48_v1 = vld [vmem:[%s2706_s1 + $0x30] sm:$0xff]  ;;  %v47_v2 = vld [vmem:[%s2706_s1 + $0x28] sm:$0xff]  ;;  %133 = vmatprep.mubr.f32.mxu0 %v2106_v4 }
   0x2   :  { %93 = vmatprep.subr.mxu0 %v49_v0  ;;  %v46_v3 = vld [vmem:[%s2706_s1 + $0x20] sm:$0xff]  ;;  %v45_v5 = vld [vmem:[%s2706_s1 + $0x18] sm:$0xff]  ;;  %v44_v6 = vld [vmem:[%s2706_s1 + $0x10] sm:$0xff] }
   0x3   :  { %94 = vmatpush1.msra.mxu0 %v48_v1  ;;  %v43_v7 = vld [vmem:[%s2706_s1 + $0x8] sm:$0xff]  ;;  %v191_v8 = vld [vmem:[%s2707_s2 + $0x78] sm:$0xff]  ;;  %v42_v9 = vld [vmem:[%s2706_s1] sm:$0xff] }
   0x4   :  { %95 = vmatprep.subr.mxu0 %v47_v2  ;;  %1782 = vmatprep.subr.mxu1 %v191_v8  ;;  %v190_v10 = vld [vmem:[%s2707_s2 + $0x70] sm:$0xff]  ;;  %v36_v11 = vld [vmem:[%s2705_s0] sm:$0xff]  ;;  %v1528_v12 = vld [vmem:[%s2707_s2 + $0xf8] sm:$0xff] }
   0x5   :  { %96 = vmatpush1.msra.mxu0 %v46_v3  ;;  %1783 = vmatpush3.msra.mxu1 %v191_v8  ;;  %v1527_v13 = vld [vmem:[%s2707_s2 + $0xf0] sm:$0xff]  ;;  %v189_v14 = vld [vmem:[%s2707_s2 + $0x68] sm:$0xff]  ;;  %v188_v17 = vld [vmem:[%s2707_s2 + $0x60] sm:$0xff] }
   0x6   :  { %97 = vmatprep.subr.mxu0 %v45_v5  ;;  %1784 = vmatprep.subr.mxu1 %v190_v10  ;;  %v37_v15 = vld [vmem:[%s2705_s0 + $0x8] sm:$0xff]  ;;  %v1525_v18 = vld [vmem:[%s2707_s2 + $0xe0] sm:$0xff] }
   0x7   :  { %98 = vmatpush1.msra.mxu0 %v44_v6  ;;  %1785 = vmatpush3.msra.mxu1 %v190_v10  ;;  %v1526_v16 = vld [vmem:[%s2707_s2 + $0xe8] sm:$0xff] }
   0x8   :  { %99 = vmatprep.subr.mxu0 %v43_v7  ;;  %1786 = vmatprep.subr.mxu1 %v189_v14 }
   0x9   :  { %100 = vmatpush1.msra.mxu0 %v42_v9  ;;  %1787 = vmatpush3.msra.mxu1 %v189_v14 }
   0xa   :  { %1507 = vmatmul.mubr.msk.f32.vlgmr.msra.gmra.mxu0 %vm50_vm0, %v36_v11  ;;  %1823 = vmatprep.subr.mxu0 %v1528_v12 }
   0xb   :  { %139 = vmatprep.mubr.f32.mxu0 %v2106_v4  ;;  %1824 = vmatpush3.msra.mxu0 %v1528_v12 }
   0xc   :  { %1825 = vmatprep.subr.mxu0 %v1527_v13 }
   0xd   :  { %1826 = vmatpush3.msra.mxu0 %v1527_v13 }
   0xe   :  { %1508 = vmatmul.mubr.msk.f32.gmra.mxu0 %vm50_vm0, %v37_v15  ;;  %1827 = vmatprep.subr.mxu0 %v1526_v16 }
   0xf   :  { %15 = vsyncpa [#allocation3], 0  ;;  %145 = vmatprep.mubr.f32.mxu0 %v2106_v4  ;;  %v38_v19 = vld [vmem:[%s2705_s0 + $0x10] sm:$0xff]  ;;  %1828 = vmatpush3.msra.mxu0 %v1526_v16  ;;  %v187_v20 = vld [vmem:[%s2707_s2 + $0x58] sm:$0xff]  ;;  %v2107_v51 = vmov 0   ;;  %vm295_vm1 = vcmask 1041408  }
  0x10   :  { %1788 = vmatprep.subr.mxu1 %v188_v17  ;;  %1829 = vmatprep.subr.mxu0 %v1525_v18  ;;  %v1524_v21 = vld [vmem:[%s2707_s2 + $0xd8] sm:$0xff]  ;;  %v186_v22 = vld [vmem:[%s2707_s2 + $0x50] sm:$0xff]  ;;  %v185_v25 = vld [vmem:[%s2707_s2 + $0x48] sm:$0xff]  ;;  %vm439_vm2 = vcmask 1040384   ;;  %vm699_vm3 = vcmask 1046528   ;;  %vm843_vm4 = vcmask 1045504  }
  0x11   :  { %1789 = vmatpush3.msra.mxu1 %v188_v17  ;;  %1830 = vmatpush3.msra.mxu0 %v1525_v18  ;;  %v1523_v23 = vld [vmem:[%s2707_s2 + $0xd0] sm:$0xff]  ;;  %v39_v24 = vld [vmem:[%s2705_s0 + $0x18] sm:$0xff]  ;;  %v1522_v26 = vld [vmem:[%s2707_s2 + $0xc8] sm:$0xff]  ;;  %vm920_vm5 = vcmask 523264   ;;  %vm1489_vm6 = vcmask 1041409  }
  0x12   :  { %1509 = vmatmul.mubr.msk.f32.gmra.mxu0 %vm50_vm0, %v38_v19  ;;  %1790 = vmatprep.subr.mxu1 %v187_v20  ;;  %v40_v27 = vld [vmem:[%s2705_s0 + $0x20] sm:$0xff]  ;;  %v183_v30 = vld [vmem:[%s2707_s2 + $0x38] sm:$0xff]  ;;  %v41_v32 = vld [vmem:[%s2705_s0 + $0x28] sm:$0xff]  ;;  %s2108_s0 = smov [#allocation2]  }
  0x13   :  { %151 = vmatprep.mubr.f32.mxu0 %v2106_v4  ;;  %1831 = vmatprep.subr.mxu0 %v1524_v21  ;;  %v184_v28 = vld [vmem:[%s2707_s2 + $0x40] sm:$0xff]  ;;  %v1520_v31 = vld [vmem:[%s2707_s2 + $0xb8] sm:$0xff]  ;;  %v182_v33 = vld [vmem:[%s2707_s2 + $0x30] sm:$0xff]  ;;  %s1499_s20 = sshll.u32 %s2108_s0, 4  ;;  %s1500_s20 = int_to_ptr.vmem [resolvable:$true] %s1499_s20 }
  0x14   :  { %1791 = vmatpush3.msra.mxu1 %v187_v20  ;;  %1832 = vmatpush3.msra.mxu0 %v1524_v21  ;;  %v1521_v29 = vld [vmem:[%s2707_s2 + $0xc0] sm:$0xff]  ;;  %v1519_v34 = vld [vmem:[%s2707_s2 + $0xb0] sm:$0xff]  ;;  %v181_v35 = vld [vmem:[%s2707_s2 + $0x28] sm:$0xff]  ;;  %s2084_s21 = scalar_lea.vmem %s1500_s20, 32  ;;  %p2089_p1 = scmp.lt.s32.totalorder %s1500_s20, %s1500_s20 }
  0x15   :  { %1792 = vmatprep.subr.mxu1 %v186_v22  ;;  %1833 = vmatprep.subr.mxu0 %v1523_v23  ;;  %v1518_v36 = vld [vmem:[%s2707_s2 + $0xa8] sm:$0xff]  ;;  %v180_v37 = vld [vmem:[%s2707_s2 + $0x20] sm:$0xff]  ;;  %v179_v39 = vld [vmem:[%s2707_s2 + $0x18] sm:$0xff]  ;;  %p2085_p0 = scmp.ne.s32.totalorder %s1500_s20, %s2084_s21  ;;  %p2090_p2 = scmp.lt.s32.totalorder %s2084_s21, %s2084_s21 }
  0x16   :  { %1510 = vmatmul.mubr.msk.f32.gmra.mxu0 %vm50_vm0, %v39_v24  ;;  %1793 = vmatpush3.msra.mxu1 %v186_v22  ;;  %v1517_v38 = vld [vmem:[%s2707_s2 + $0xa0] sm:$0xff]  ;;  %v1516_v40 = vld [vmem:[%s2707_s2 + $0x98] sm:$0xff]  ;;  %v178_v41 = vld [vmem:[%s2707_s2 + $0x10] sm:$0xff] }
  0x17   :  { %157 = vmatprep.mubr.f32.mxu0 %v2106_v4  ;;  %1834 = vmatpush3.msra.mxu0 %v1523_v23  ;;  %v1515_v42 = vld [vmem:[%s2707_s2 + $0x90] sm:$0xff]  ;;  %v177_v43 = vld [vmem:[%s2707_s2 + $0x8] sm:$0xff]  ;;  %v176_v45 = vld [vmem:[%s2707_s2] sm:$0xff]  ;;  %p2091_p3 = por %p2090_p2, %p2089_p1 }
  0x18   :  { %1794 = vmatprep.subr.mxu1 %v185_v25  ;;  %1835 = vmatprep.subr.mxu0 %v1522_v26  ;;  %v1514_v44 = vld [vmem:[%s2707_s2 + $0x88] sm:$0xff]  ;;  %v1513_v46 = vld [vmem:[%s2707_s2 + $0x80] sm:$0xff]  ;;  %v1544_v47 = vld [vmem:[%s2707_s2 + $0x178] sm:$0xff] }
  0x19   :  { %1795 = vmatpush3.msra.mxu1 %v185_v25  ;;  %1836 = vmatpush3.msra.mxu0 %v1522_v26  ;;  %v1560_v48 = vld [vmem:[%s2707_s2 + $0x1f8] sm:$0xff]  ;;  %v888_v49 = vld [vmem:[%s2714_s9] sm:$0xff]  ;;  %v890_v50 = vld [vmem:[%s2714_s9 + $0x10] sm:$0xff]  ;;  %p2092_p4 = pnand %p2091_p3, %p2085_p0 }
  0x1a   :  { %1511 = vmatmul.mubr.msk.f32.gmra.mxu0 %vm50_vm0, %v40_v27  ;;  %1796 = vmatprep.subr.mxu1 %v184_v28  ;;  %v889_v52 = vld [vmem:[%s2714_s9 + $0x8] sm:$0xff]  ;;  %v1543_v59 = vld [vmem:[%s2707_s2 + $0x170] sm:$0xff]  ;;  %v1541_v1 = vld [vmem:[%s2707_s2 + $0x160] sm:$0xff] }
  0x1b   :  { %163 = vmatprep.mubr.f32.mxu0 %v2106_v4  ;;  %1837 = vmatprep.subr.mxu0 %v1521_v29  ;;  %v1559_v60 = vld [vmem:[%s2707_s2 + $0x1f0] sm:$0xff]  ;;  %v1542_v62 = vld [vmem:[%s2707_s2 + $0x168] sm:$0xff]  ;;  %v1557_v2 = vld [vmem:[%s2707_s2 + $0x1e0] sm:$0xff] }
  0x1c   :  { %1797 = vmatpush3.msra.mxu1 %v184_v28  ;;  %1838 = vmatpush3.msra.mxu0 %v1521_v29  ;;  %v1558_v63 = vld [vmem:[%s2707_s2 + $0x1e8] sm:$0xff]  ;;  %v1540_v6 = vld [vmem:[%s2707_s2 + $0x158] sm:$0xff]  ;;  %v1539_v10 = vld [vmem:[%s2707_s2 + $0x150] sm:$0xff] }
  0x1d   :  { %1798 = vmatprep.subr.mxu1 %v183_v30  ;;  %1839 = vmatprep.subr.mxu0 %v1520_v31  ;;  %v1556_v7 = vld [vmem:[%s2707_s2 + $0x1d8] sm:$0xff]  ;;  %v1555_v11 = vld [vmem:[%s2707_s2 + $0x1d0] sm:$0xff]  ;;  %v1538_v13 = vld [vmem:[%s2707_s2 + $0x148] sm:$0xff] }
  0x1e   :  { %1512 = vmatmul.mubr.msk.f32.gmra.mxu0 %vm50_vm0, %v41_v32  ;;  %1799 = vmatpush3.msra.mxu1 %v183_v30  ;;  %v1554_v14 = vld [vmem:[%s2707_s2 + $0x1c8] sm:$0xff]  ;;  %v1537_v16 = vld [vmem:[%s2707_s2 + $0x140] sm:$0xff]  ;;  %v1536_v20 = vld [vmem:[%s2707_s2 + $0x138] sm:$0xff] }
  0x1f   :  { %1840 = vmatpush3.msra.mxu0 %v1520_v31  ;;  %1800 = vmatprep.subr.mxu1 %v182_v33  ;;  %v1553_v17 = vld [vmem:[%s2707_s2 + $0x1c0] sm:$0xff]  ;;  %v1552_v21 = vld [vmem:[%s2707_s2 + $0x1b8] sm:$0xff]  ;;  %v1535_v22 = vld [vmem:[%s2707_s2 + $0x130] sm:$0xff] }
  0x20   :  { %1841 = vmatprep.subr.mxu0 %v1519_v34  ;;  %1801 = vmatpush3.msra.mxu1 %v182_v33  ;;  %v1551_v23 = vld [vmem:[%s2707_s2 + $0x1b0] sm:$0xff]  ;;  %v1534_v24 = vld [vmem:[%s2707_s2 + $0x128] sm:$0xff]  ;;  %v1533_v26 = vld [vmem:[%s2707_s2 + $0x120] sm:$0xff] }
  0x21   :  { %1842 = vmatpush3.msra.mxu0 %v1519_v34  ;;  %1802 = vmatprep.subr.mxu1 %v181_v35  ;;  %v1550_v25 = vld [vmem:[%s2707_s2 + $0x1a8] sm:$0xff]  ;;  %v1549_v27 = vld [vmem:[%s2707_s2 + $0x1a0] sm:$0xff]  ;;  %v1532_v28 = vld [vmem:[%s2707_s2 + $0x118] sm:$0xff] }
  0x22   :  { %1843 = vmatprep.subr.mxu0 %v1518_v36  ;;  %1803 = vmatpush3.msra.mxu1 %v181_v35  ;;  %v1548_v29 = vld [vmem:[%s2707_s2 + $0x198] sm:$0xff]  ;;  %v1531_v30 = vld [vmem:[%s2707_s2 + $0x110] sm:$0xff]  ;;  %v1530_v32 = vld [vmem:[%s2707_s2 + $0x108] sm:$0xff] }
  0x23   :  { %1844 = vmatpush3.msra.mxu0 %v1518_v36  ;;  %1804 = vmatprep.subr.mxu1 %v180_v37  ;;  %v1547_v31 = vld [vmem:[%s2707_s2 + $0x190] sm:$0xff]  ;;  %v1546_v33 = vld [vmem:[%s2707_s2 + $0x188] sm:$0xff]  ;;  %v1529_v34 = vld [vmem:[%s2707_s2 + $0x100] sm:$0xff] }
  0x24   :  { %1845 = vmatprep.subr.mxu0 %v1517_v38  ;;  %1805 = vmatpush3.msra.mxu1 %v180_v37  ;;  %v1545_v35 = vld [vmem:[%s2707_s2 + $0x180] sm:$0xff]  ;;  %v1576_v36 = vld [vmem:[%s2707_s2 + $0x278] sm:$0xff]  ;;  %v1575_v37 = vld [vmem:[%s2707_s2 + $0x270] sm:$0xff] }
  0x25   :  { %1846 = vmatpush3.msra.mxu0 %v1517_v38  ;;  %1806 = vmatprep.subr.mxu1 %v179_v39  ;;  %v1574_v38 = vld [vmem:[%s2707_s2 + $0x268] sm:$0xff] }
  0x26   :  { %1847 = vmatprep.subr.mxu0 %v1516_v40  ;;  %1807 = vmatpush3.msra.mxu1 %v179_v39  ;;  %v1573_v39 = vld [vmem:[%s2707_s2 + $0x260] sm:$0xff] }
  0x27   :  { %1848 = vmatpush3.msra.mxu0 %v1516_v40  ;;  %1808 = vmatprep.subr.mxu1 %v178_v41  ;;  %v1572_v40 = vld [vmem:[%s2707_s2 + $0x258] sm:$0xff] }
  0x28   :  { %1849 = vmatprep.subr.mxu0 %v1515_v42  ;;  %1809 = vmatpush3.msra.mxu1 %v178_v41  ;;  %v1571_v41 = vld [vmem:[%s2707_s2 + $0x250] sm:$0xff] }
  0x29   :  { %1850 = vmatpush3.msra.mxu0 %v1515_v42  ;;  %1810 = vmatprep.subr.mxu1 %v177_v43  ;;  %v1570_v42 = vld [vmem:[%s2707_s2 + $0x248] sm:$0xff] }
  0x2a   :  { %1851 = vmatprep.subr.mxu0 %v1514_v44  ;;  %1811 = vmatpush3.msra.mxu1 %v177_v43  ;;  %v1569_v43 = vld [vmem:[%s2707_s2 + $0x240] sm:$0xff] }
  0x2b   :  { %1852 = vmatpush3.msra.mxu0 %v1514_v44  ;;  %1812 = vmatprep.subr.mxu1 %v176_v45  ;;  %v1568_v44 = vld [vmem:[%s2707_s2 + $0x238] sm:$0xff] }
  0x2c   :  { %1853 = vmatprep.subr.mxu0 %v1513_v46  ;;  %1813 = vmatpush3.msra.mxu1 %v176_v45  ;;  %v1567_v45 = vld [vmem:[%s2707_s2 + $0x230] sm:$0xff] }
  0x2d   :  { %1854 = vmatpush3.msra.mxu0 %v1513_v46  ;;  %1864 = vmatprep.subr.mxu1 %v1544_v47  ;;  %v1566_v46 = vld [vmem:[%s2707_s2 + $0x228] sm:$0xff] }
  0x2e   :  { %1905 = vmatprep.subr.mxu0 %v1560_v48  ;;  %2082 = vset.pattern.permute.xlu0 %v2107_v51 }
  0x2f   :  { %2083 = vset.pattern.permute.xlu1 %v2107_v51  ;;  %893 = vperm.xlu0 %2082, %v888_v49   ;;  %v1563_v49 = vld [vmem:[%s2707_s2 + $0x210] sm:$0xff]  ;;  %v1561_v51 = vld [vmem:[%s2707_s2 + $0x200] sm:$0xff] }
  0x30   :  { %903 = vperm.xlu1 %2083, %v890_v50   ;;  %v1562_v50 = vld [vmem:[%s2707_s2 + $0x208] sm:$0xff] }
  0x33   :  { %898 = vperm.xlu0 %2082, %v889_v52   ;;  %v919_v52 = vld [vmem:[%s2709_s4 + $0x38] sm:$0xff] }
  0xca   :  { %v135_v53 = vpop.f32.mrf.mxu0 }
  0xcb   :  { %v2329_v54 = vmax.f32 %v135_v53, 0.0  ;;  %v1605_v53 = vld [vmem:[%s2709_s4 + $0xb8] sm:$0xff] }
  0xcc   :  { %v2331_v55 = vpop.f32.mrf.mxu0 }
  0xcd   :  { %1814 = vmatprep.mubr.f32.mxu1 %v2329_v54  ;;  %1855 = vmatprep.mubr.f32.mxu0 %v2329_v54 }
  0xce   :  { %v141_v56 = vpop.f32.mrf.mxu0 }
  0xcf   :  { %v2335_v57 = vmax.f32 %v141_v56, 0.0  ;;  %v1604_v56 = vld [vmem:[%s2709_s4 + $0xb0] sm:$0xff] }
  0xd0   :  { %v2337_v58 = vpop.f32.mrf.mxu0 }
  0xd1   :  { %1815 = vmatmul.mubr.f32.vlgmr.msra.gmra.mxu1 %v2335_v57  ;;  %1856 = vmatmul.mubr.f32.vlgmr.msra.gmra.mxu0 %v2335_v57 }
  0xd2   :  { %1865 = vmatpush3.msra.mxu1 %v1544_v47  ;;  %1906 = vmatpush3.msra.mxu0 %v1560_v48  ;;  %v147_v61 = vpop.f32.mrf.mxu0  ;;  %v1565_v47 = vld [vmem:[%s2707_s2 + $0x220] sm:$0xff]  ;;  %v1564_v48 = vld [vmem:[%s2707_s2 + $0x218] sm:$0xff] }
  0xd3   :  { %1866 = vmatprep.subr.mxu1 %v1543_v59  ;;  %1907 = vmatprep.subr.mxu0 %v1559_v60  ;;  %v2361_v3 = vmax.f32 %v147_v61, 0.0  ;;  %v1602_v61 = vld [vmem:[%s2709_s4 + $0xa0] sm:$0xff] }
  0xd4   :  { %1867 = vmatpush3.msra.mxu1 %v1543_v59  ;;  %1908 = vmatpush3.msra.mxu0 %v1559_v60  ;;  %v2353_v0 = vpop.f32.mrf.mxu0  ;;  %v1603_v59 = vld [vmem:[%s2709_s4 + $0xa8] sm:$0xff]  ;;  %v916_v60 = vld [vmem:[%s2709_s4 + $0x20] sm:$0xff] }
  0xd5   :  { %1868 = vmatprep.subr.mxu1 %v1542_v62  ;;  %1909 = vmatprep.subr.mxu0 %v1558_v63 }
  0xd6   :  { %1869 = vmatpush3.msra.mxu1 %v1542_v62  ;;  %1910 = vmatpush3.msra.mxu0 %v1558_v63  ;;  %v153_v4 = vpop.f32.mrf.mxu0  ;;  %v915_v62 = vld [vmem:[%s2709_s4 + $0x18] sm:$0xff] }
  0xd7   :  { %v2363_v5 = vmax.f32 %v153_v4, 0.0  ;;  %1870 = vmatprep.subr.mxu1 %v1541_v1  ;;  %1911 = vmatprep.subr.mxu0 %v1557_v2  ;;  %v1601_v63 = vld [vmem:[%s2709_s4 + $0x98] sm:$0xff]  ;;  %v1599_v4 = vld [vmem:[%s2709_s4 + $0x88] sm:$0xff] }
  0xd8   :  { %1871 = vmatpush3.msra.mxu1 %v1541_v1  ;;  %1912 = vmatpush3.msra.mxu0 %v1557_v2  ;;  %v2371_v8 = vpop.f32.mrf.mxu0  ;;  %v914_v1 = vld [vmem:[%s2709_s4 + $0x10] sm:$0xff] }
  0xd9   :  { %1817 = vmatprep.mubr.f32.mxu1 %v2361_v3  ;;  %1858 = vmatprep.mubr.f32.mxu0 %v2361_v3  ;;  %v1600_v2 = vld [vmem:[%s2709_s4 + $0x90] sm:$0xff] }
  0xda   :  { %1872 = vmatprep.subr.mxu1 %v1540_v6  ;;  %1913 = vmatprep.subr.mxu0 %v1556_v7  ;;  %v159_v9 = vpop.f32.mrf.mxu0 }
  0xdb   :  { %1818 = vmatmul.mubr.f32.gmra.mxu1 %v2363_v5  ;;  %1859 = vmatmul.mubr.f32.gmra.mxu0 %v2363_v5  ;;  %v2397_v18 = vmax.f32 %v159_v9, 0.0 }
  0xdc   :  { %1873 = vmatpush3.msra.mxu1 %v1540_v6  ;;  %1914 = vmatpush3.msra.mxu0 %v1556_v7  ;;  %v2383_v12 = vpop.f32.mrf.mxu0  ;;  %v1598_v6 = vld [vmem:[%s2709_s4 + $0x80] sm:$0xff]  ;;  %v2570_v7 = vld [vmem:[%s2709_s4 + $0x78] sm:$0xff] }
  0xdd   :  { %1874 = vmatprep.subr.mxu1 %v1539_v10  ;;  %1915 = vmatprep.subr.mxu0 %v1555_v11 }
  0xde   :  { %1875 = vmatpush3.msra.mxu1 %v1539_v10  ;;  %1916 = vmatpush3.msra.mxu0 %v1555_v11  ;;  %v165_v15 = vpop.f32.mrf.mxu0 }
  0xdf   :  { %1876 = vmatprep.subr.mxu1 %v1538_v13  ;;  %1917 = vmatprep.subr.mxu0 %v1554_v14  ;;  %v2399_v19 = vmax.f32 %v165_v15, 0.0 }
  0xe0   :  { %1877 = vmatpush3.msra.mxu1 %v1538_v13  ;;  %1918 = vmatpush3.msra.mxu0 %v1554_v14  ;;  %v2573_v10 = vpop.f32.mrf.mxu0 }
  0xe1   :  { %1878 = vmatprep.subr.mxu1 %v1537_v16  ;;  %1919 = vmatprep.subr.mxu0 %v1553_v17 }
  0xe2   :  { %1879 = vmatpush3.msra.mxu1 %v1537_v16  ;;  %1920 = vmatpush3.msra.mxu0 %v1553_v17 }
  0xe3   :  { %1820 = vmatprep.mubr.f32.mxu1 %v2397_v18  ;;  %1861 = vmatprep.mubr.f32.mxu0 %v2397_v18 }
  0xe4   :  { %1880 = vmatprep.subr.mxu1 %v1536_v20  ;;  %1921 = vmatprep.subr.mxu0 %v1552_v21 }
  0xe5   :  { %1821 = vmatmul.mubr.f32.gmra.mxu1 %v2399_v19  ;;  %1862 = vmatmul.mubr.f32.gmra.mxu0 %v2399_v19 }
  0xe6   :  { %1881 = vmatpush3.msra.mxu1 %v1536_v20  ;;  %1922 = vmatpush3.msra.mxu0 %v1552_v21 }
  0xe7   :  { %1882 = vmatprep.subr.mxu1 %v1535_v22  ;;  %1896 = vmatprep.mubr.f32.mxu1 %v2329_v54 }
  0xe8   :  { %1923 = vmatprep.subr.mxu0 %v1551_v23  ;;  %1937 = vmatprep.mubr.f32.mxu0 %v2329_v54 }
  0xe9   :  { %1883 = vmatpush3.msra.mxu1 %v1535_v22  ;;  %1924 = vmatpush3.msra.mxu0 %v1551_v23 }
  0xea   :  { %1884 = vmatprep.subr.mxu1 %v1534_v24  ;;  %1925 = vmatprep.subr.mxu0 %v1550_v25 }
  0xeb   :  { %1885 = vmatpush3.msra.mxu1 %v1534_v24  ;;  %1926 = vmatpush3.msra.mxu0 %v1550_v25 }
  0xec   :  { %1886 = vmatprep.subr.mxu1 %v1533_v26  ;;  %1927 = vmatprep.subr.mxu0 %v1549_v27 }
  0xed   :  { %1887 = vmatpush3.msra.mxu1 %v1533_v26  ;;  %1928 = vmatpush3.msra.mxu0 %v1549_v27 }
  0xee   :  { %1888 = vmatprep.subr.mxu1 %v1532_v28  ;;  %1929 = vmatprep.subr.mxu0 %v1548_v29 }
  0xef   :  { %1889 = vmatpush3.msra.mxu1 %v1532_v28  ;;  %1930 = vmatpush3.msra.mxu0 %v1548_v29 }
  0xf0   :  { %1890 = vmatprep.subr.mxu1 %v1531_v30  ;;  %1931 = vmatprep.subr.mxu0 %v1547_v31 }
  0xf1   :  { %1891 = vmatpush3.msra.mxu1 %v1531_v30  ;;  %1932 = vmatpush3.msra.mxu0 %v1547_v31 }
  0xf2   :  { %1892 = vmatprep.subr.mxu1 %v1530_v32  ;;  %1933 = vmatprep.subr.mxu0 %v1546_v33 }
  0xf3   :  { %1893 = vmatpush3.msra.mxu1 %v1530_v32  ;;  %1934 = vmatpush3.msra.mxu0 %v1546_v33 }
  0xf4   :  { %1894 = vmatprep.subr.mxu1 %v1529_v34  ;;  %1935 = vmatprep.subr.mxu0 %v1545_v35 }
  0xf5   :  { %1895 = vmatpush3.msra.mxu1 %v1529_v34  ;;  %1936 = vmatpush3.msra.mxu0 %v1545_v35 }
  0xf6   :  { %1897 = vmatmul.mubr.f32.vlgmr.msra.gmra.mxu1 %v2335_v57  ;;  %1938 = vmatmul.mubr.f32.vlgmr.msra.gmra.mxu0 %v2335_v57 }
  0xf7   :  { %1946 = vmatprep.subr.mxu1 %v1576_v36  ;;  %1899 = vmatprep.mubr.f32.mxu1 %v2361_v3 }
  0xf8   :  { %1940 = vmatprep.mubr.f32.mxu0 %v2361_v3  ;;  %1947 = vmatpush3.msra.mxu1 %v1576_v36 }
  0xf9   :  { %1948 = vmatprep.subr.mxu1 %v1575_v37  ;;  %1987 = vmatprep.subr.mxu0 %v919_v52 }
  0xfa   :  { %1949 = vmatpush3.msra.mxu1 %v1575_v37  ;;  %1941 = vmatmul.mubr.f32.gmra.mxu0 %v2363_v5 }
  0xfb   :  { %1900 = vmatmul.mubr.f32.gmra.mxu1 %v2363_v5  ;;  %1950 = vmatprep.subr.mxu1 %v1574_v38 }
  0xfc   :  { %1902 = vmatprep.mubr.f32.mxu1 %v2397_v18  ;;  %1943 = vmatprep.mubr.f32.mxu0 %v2397_v18 }
  0xfd   :  { %1951 = vmatpush3.msra.mxu1 %v1574_v38  ;;  %1988 = vmatpush3.msra.mxu0 %v919_v52 }
  0xfe   :  { %1952 = vmatprep.subr.mxu1 %v1573_v39  ;;  %1944 = vmatmul.mubr.f32.gmra.mxu0 %v2399_v19 }
  0xff   :  { %1953 = vmatpush3.msra.mxu1 %v1573_v39 }
 0x100   :  { %1903 = vmatmul.mubr.f32.gmra.mxu1 %v2399_v19  ;;  %1954 = vmatprep.subr.mxu1 %v1572_v40 }
 0x101   :  { %1955 = vmatpush3.msra.mxu1 %v1572_v40  ;;  %1978 = vmatprep.mubr.f32.mxu1 %v2329_v54  ;;  %v918_v54 = vld [vmem:[%s2709_s4 + $0x30] sm:$0xff] }
 0x102   :  { %1956 = vmatprep.subr.mxu1 %v1571_v41  ;;  %1989 = vmatprep.subr.mxu0 %v918_v54 }
 0x103   :  { %1957 = vmatpush3.msra.mxu1 %v1571_v41  ;;  %1990 = vmatpush3.msra.mxu0 %v918_v54 }
 0x104   :  { %1958 = vmatprep.subr.mxu1 %v1570_v42 }
 0x105   :  { %1959 = vmatpush3.msra.mxu1 %v1570_v42 }
 0x106   :  { %1960 = vmatprep.subr.mxu1 %v1569_v43 }
 0x107   :  { %1961 = vmatpush3.msra.mxu1 %v1569_v43 }
 0x108   :  { %1962 = vmatprep.subr.mxu1 %v1568_v44 }
 0x109   :  { %1963 = vmatpush3.msra.mxu1 %v1568_v44 }
 0x10a   :  { %1964 = vmatprep.subr.mxu1 %v1567_v45 }
 0x10b   :  { %1965 = vmatpush3.msra.mxu1 %v1567_v45 }
 0x10c   :  { %1966 = vmatprep.subr.mxu1 %v1566_v46 }
 0x10d   :  { %1967 = vmatpush3.msra.mxu1 %v1566_v46 }
 0x10e   :  { %1968 = vmatprep.subr.mxu1 %v1565_v47 }
 0x10f   :  { %1969 = vmatpush3.msra.mxu1 %v1565_v47 }
 0x110   :  { %1970 = vmatprep.subr.mxu1 %v1564_v48 }
 0x111   :  { %1971 = vmatpush3.msra.mxu1 %v1564_v48 }
 0x112   :  { %1972 = vmatprep.subr.mxu1 %v1563_v49 }
 0x113   :  { %1973 = vmatpush3.msra.mxu1 %v1563_v49 }
 0x114   :  { %1974 = vmatprep.subr.mxu1 %v1562_v50 }
 0x115   :  { %1975 = vmatpush3.msra.mxu1 %v1562_v50 }
 0x116   :  { %1976 = vmatprep.subr.mxu1 %v1561_v51 }
 0x117   :  { %1977 = vmatpush3.msra.mxu1 %v1561_v51 }
 0x118   :  { %1979 = vmatmul.mubr.f32.vlgmr.msra.gmra.mxu1 %v2335_v57  ;;  %2037 = vmatprep.subr.mxu1 %v1605_v53  ;;  %v917_v57 = vld [vmem:[%s2709_s4 + $0x28] sm:$0xff] }
 0x119   :  { %1981 = vmatprep.mubr.f32.mxu1 %v2361_v3  ;;  %2038 = vmatpush3.msra.mxu1 %v1605_v53  ;;  %v913_v3 = vld [vmem:[%s2709_s4 + $0x8] sm:$0xff] }
 0x11a   :  { %2039 = vmatprep.subr.mxu1 %v1604_v56  ;;  %1991 = vmatprep.subr.mxu0 %v917_v57 }
 0x11b   :  { %2040 = vmatpush3.msra.mxu1 %v1604_v56  ;;  %1992 = vmatpush3.msra.mxu0 %v917_v57 }
 0x11c   :  { %1982 = vmatmul.mubr.f32.gmra.mxu1 %v2363_v5  ;;  %2041 = vmatprep.subr.mxu1 %v1603_v59  ;;  %v912_v5 = vld [vmem:[%s2709_s4] sm:$0xff] }
 0x11d   :  { %1984 = vmatprep.mubr.f32.mxu1 %v2397_v18  ;;  %1993 = vmatprep.subr.mxu0 %v916_v60 }
 0x11e   :  { %2042 = vmatpush3.msra.mxu1 %v1603_v59  ;;  %1994 = vmatpush3.msra.mxu0 %v916_v60 }
 0x11f   :  { %2043 = vmatprep.subr.mxu1 %v1602_v61  ;;  %1995 = vmatprep.subr.mxu0 %v915_v62 }
 0x120   :  { %1985 = vmatmul.mubr.f32.gmra.mxu1 %v2399_v19  ;;  %1996 = vmatpush3.msra.mxu0 %v915_v62 }
 0x121   :  { %2044 = vmatpush3.msra.mxu1 %v1602_v61  ;;  %1997 = vmatprep.subr.mxu0 %v914_v1 }
 0x122   :  { %2045 = vmatprep.subr.mxu1 %v1601_v63  ;;  %1998 = vmatpush3.msra.mxu0 %v914_v1 }
 0x123   :  { %2046 = vmatpush3.msra.mxu1 %v1601_v63  ;;  %1999 = vmatprep.subr.mxu0 %v913_v3 }
 0x124   :  { %2047 = vmatprep.subr.mxu1 %v1600_v2  ;;  %2000 = vmatpush3.msra.mxu0 %v913_v3 }
 0x125   :  { %2048 = vmatpush3.msra.mxu1 %v1600_v2  ;;  %2001 = vmatprep.subr.mxu0 %v912_v5 }
 0x126   :  { %2049 = vmatprep.subr.mxu1 %v1599_v4  ;;  %2002 = vmatpush3.msra.mxu0 %v912_v5 }
 0x127   :  { %2050 = vmatpush3.msra.mxu1 %v1599_v4  ;;  %2012 = vmatprep.subr.mxu0 %v2570_v7 }
 0x128   :  { %2051 = vmatprep.subr.mxu1 %v1598_v6 }
 0x129   :  { %2052 = vmatpush3.msra.mxu1 %v1598_v6 }
 0x191   :  { %v1816_v9 = vpop.f32.mrf.mxu1  ;;  %v1857_v11 = vpop.f32.mrf.mxu0 }
 0x192   :  { %v297_v35 = vrot.slane %v1816_v9, 6  ;;  %v441_v36 = vrot.slane %v1857_v11, 7 }
 0x193   :  { %v258_v13 = vpop.f32.mrf.mxu1  ;;  %v402_v15 = vpop.f32.mrf.mxu0 }
 0x194   :  { %v296_v32 = vrot.slane %v258_v13, 6  ;;  %v440_v33 = vrot.slane %v402_v15, 7 }
 0x196   :  { %v298_v43 = vsel %vm295_vm1, %v296_v32, %v297_v35  ;;  %v442_v44 = vsel %vm439_vm2, %v440_v33, %v441_v36 }
 0x197   :  { %v458_v60 = vadd.f32 %v442_v44, %v298_v43 }
 0x19b   :  { %v1819_v14 = vpop.f32.mrf.mxu1  ;;  %v1860_v16 = vpop.f32.mrf.mxu0 }
 0x19c   :  { %v301_v42 = vrot.slane %v1819_v14, 6  ;;  %v445_v45 = vrot.slane %v1860_v16, 7 }
 0x19d   :  { %v268_v17 = vpop.f32.mrf.mxu1  ;;  %v412_v19 = vpop.f32.mrf.mxu0 }
 0x19e   :  { %v299_v37 = vrot.slane %v268_v17, 6  ;;  %v443_v38 = vrot.slane %v412_v19, 7 }
 0x1a0   :  { %v300_v51 = vsel %vm295_vm1, %v297_v35, %v299_v37  ;;  %v444_v52 = vsel %vm439_vm2, %v441_v36, %v443_v38  ;;  %v302_v1 = vsel %vm295_vm1, %v299_v37, %v301_v42  ;;  %v446_v2 = vsel %vm439_vm2, %v443_v38, %v445_v45 }
 0x1a1   :  { %v459_v3 = vadd.f32 %v444_v52, %v300_v51 }
 0x1a5   :  { %v1822_v18 = vpop.f32.mrf.mxu1  ;;  %v1863_v21 = vpop.f32.mrf.mxu0 }
 0x1a6   :  { %v288_v30 = vrot.slane %v1822_v18, 6  ;;  %v432_v31 = vrot.slane %v1863_v21, 7 }
 0x1a7   :  { %v278_v20 = vpop.f32.mrf.mxu1  ;;  %v422_v23 = vpop.f32.mrf.mxu0 }
 0x1a8   :  { %v312_v40 = vsel %vm295_vm1, %v288_v30, %v296_v32  ;;  %v456_v41 = vsel %vm439_vm2, %v432_v31, %v440_v33  ;;  %v303_v46 = vrot.slane %v278_v20, 6  ;;  %v447_v47 = vrot.slane %v422_v23, 7 }
 0x1a9   :  { %v457_v50 = vadd.f32 %v456_v41, %v312_v40 }
 0x1aa   :  { %v305_v57 = vsel %vm295_vm1, %v303_v46, %v288_v30  ;;  %v449_v59 = vsel %vm439_vm2, %v447_v47, %v432_v31  ;;  %v304_v9 = vsel %vm295_vm1, %v301_v42, %v303_v46  ;;  %v448_v11 = vsel %vm439_vm2, %v445_v45, %v447_v47  ;;  %v894_v45 = vpop.permute.xlu0 %893 }
 0x1ab   :  { %v462_v6 = vadd.f32 %v449_v59, %v305_v57  ;;  %v460_v30 = vadd.f32 %v446_v2, %v302_v1 }
 0x1b6   :  { %v1898_v22 = vpop.f32.mrf.mxu1  ;;  %v1939_v24 = vpop.f32.mrf.mxu0 }
 0x1b7   :  { %v701_v54 = vrot.slane %v1939_v24, 1  ;;  %v576_v18 = vadd.f32 %v1898_v22, %v458_v60 }
 0x1b8   :  { %v546_v25 = vpop.f32.mrf.mxu1  ;;  %v2575_v26 = vpop.f32.mrf.mxu0 }
 0x1b9   :  { %v700_v48 = vrot.slane %v2575_v26, 1  ;;  %v575_v61 = vadd.f32 %v546_v25, %v457_v50  ;;  %v461_v25 = vadd.f32 %v448_v11, %v304_v9 }
 0x1ba   :  { %v2579_v28 = vpop.f32.mrf.mxu0 }
 0x1bb   :  { %v2577_v27 = vpop.f32.mrf.mxu1  ;;  %v702_v63 = vsel %vm699_vm3, %v700_v48, %v701_v54  ;;  %v705_v5 = vrot.slane %v2579_v28, 1  ;;  %v1577_v28 = vld [vmem:[%s2708_s3] ss:$0 sm:$0xff] }
 0x1bc   :  { %v674_v34 = vpop.f32.mrf.mxu0  ;;  %v719_v19 = vadd.f32 %v702_v63, %v575_v61  ;;  %v578_v43 = vadd.f32 %v2577_v27, %v460_v30  ;;  %v1338_v30 = vld [vmem:[%s2711_s6 + $0x18] sm:$0xff] }
 0x1bd   :  { %v556_v29 = vpop.f32.mrf.mxu1  ;;  %v703_v56 = vrot.slane %v674_v34, 1 }
 0x1be   :  { %v1945_v49 = vpop.f32.mrf.mxu0  ;;  %v577_v20 = vadd.f32 %v556_v29, %v459_v3  ;;  %v904_v3 = vpop.permute.xlu1 %903 }
 0x1bf   :  { %v704_v14 = vsel %vm699_vm3, %v701_v54, %v703_v56  ;;  %v709_v15 = vrot.slane %v1945_v49, 1  ;;  %v706_v24 = vsel %vm699_vm3, %v703_v56, %v705_v5 }
 0x1c0   :  { %v1904_v39 = vpop.f32.mrf.mxu1  ;;  %v684_v4 = vpop.f32.mrf.mxu0  ;;  %v720_v31 = vadd.f32 %v704_v14, %v576_v18  ;;  %v721_v37 = vadd.f32 %v706_v24, %v577_v20  ;;  %v1589_v18 = vld [vmem:[%s2709_s4 + $0x68] sm:$0xff] }
 0x1c1   :  { %v707_v21 = vrot.slane %v684_v4, 1  ;;  %v580_v32 = vadd.f32 %v1904_v39, %v462_v6  ;;  %v718_v22 = vsel %vm699_vm3, %v709_v15, %v700_v48  ;;  %v899_v4 = vpop.permute.xlu0 %898 }
 0x1c2   :  { %v566_v53 = vpop.f32.mrf.mxu1 }
 0x1c3   :  { %v579_v29 = vadd.f32 %v566_v53, %v461_v25  ;;  %v708_v38 = vsel %vm699_vm3, %v705_v5, %v707_v21  ;;  %v710_v40 = vsel %vm699_vm3, %v707_v21, %v709_v15  ;;  %v724_v47 = vadd.f32 %v718_v22, %v580_v32  ;;  %v1590_v15 = vld [vmem:[%s2709_s4 + $0x70] sm:$0xff]  ;;  %v1336_v32 = vld [vmem:[%s2711_s6 + $0x8] sm:$0xff] }
 0x1c4   :  { %v722_v52 = vadd.f32 %v708_v38, %v578_v43  ;;  %v1586_v25 = vld [vmem:[%s2709_s4 + $0x50] sm:$0xff] }
 0x1c5   :  { %v723_v53 = vadd.f32 %v710_v40, %v579_v29 }
 0x1d8   :  { %v1980_v62 = vpop.f32.mrf.mxu1 }
 0x1d9   :  { %v845_v16 = vrot.slane %v1980_v62, 2 }
 0x1da   :  { %v808_v13 = vpop.f32.mrf.mxu1 }
 0x1db   :  { %v844_v17 = vrot.slane %v808_v13, 2 }
 0x1dc   :  { %v1983_v23 = vpop.f32.mrf.mxu1 }
 0x1dd   :  { %v846_v26 = vsel %vm843_vm4, %v844_v17, %v845_v16  ;;  %v849_v35 = vrot.slane %v1983_v23, 2  ;;  %v1588_v23 = vld [vmem:[%s2709_s4 + $0x60] sm:$0xff] }
 0x1de   :  { %v863_v33 = vadd.f32 %v846_v26, %v719_v19  ;;  %v818_v34 = vpop.f32.mrf.mxu1  ;;  %v1585_v26 = vld [vmem:[%s2709_s4 + $0x48] sm:$0xff] }
 0x1df   :  { %v847_v36 = vrot.slane %v818_v34, 2 }
 0x1e0   :  { %v876_v41 = vadd.f32 %v1577_v28, %v863_v33  ;;  %v1986_v42 = vpop.f32.mrf.mxu1  ;;  %v1335_v33 = vld [vmem:[%s2711_s6] sm:$0xff] }
 0x1e1   :  { %v848_v44 = vsel %vm843_vm4, %v845_v16, %v847_v36  ;;  %v850_v39 = vsel %vm843_vm4, %v847_v36, %v849_v35  ;;  %v853_v46 = vrot.slane %v1986_v42, 2 }
 0x1e2   :  { %v882_v48 = vmax.f32 %v876_v41, 0.0  ;;  %v828_v49 = vpop.f32.mrf.mxu1  ;;  %v864_v50 = vadd.f32 %v848_v44, %v720_v31  ;;  %v865_v51 = vadd.f32 %v850_v39, %v721_v37  ;;  %v1337_v31 = vld [vmem:[%s2711_s6 + $0x10] sm:$0xff] }
 0x1e3   :  { %v862_v54 = vsel %vm843_vm4, %v853_v46, %v844_v17  ;;  %v851_v56 = vrot.slane %v828_v49, 2 }
 0x1e4   :  { %v906_v57 = vmul.f32 %v894_v45, %v882_v48  ;;  %v877_v59 = vadd.f32 %v1577_v28, %v864_v50  ;;  %v868_v60 = vadd.f32 %v862_v54, %v724_v47  ;;  %v878_v27 = vadd.f32 %v1577_v28, %v865_v51 }
 0x1e5   :  { %v852_v61 = vsel %vm843_vm4, %v849_v35, %v851_v56  ;;  %v854_v62 = vsel %vm843_vm4, %v851_v56, %v853_v46 }
 0x1e6   :  { %v866_v63 = vadd.f32 %v852_v61, %v722_v52  ;;  %v867_v1 = vadd.f32 %v854_v62, %v723_v53  ;;  %v883_v2 = vmax.f32 %v877_v59, 0.0  ;;  %2003 = vmatprep.mubr.msk.f32.mxu0 %vm920_vm5, %v906_v57  ;;  %2053 = vmatprep.mubr.msk.f32.mxu1 %vm920_vm5, %v906_v57  ;;  %v884_v5 = vmax.f32 %v878_v27, 0.0  ;;  %v1612_v59 = vld [vmem:[%s2710_s5] ss:$0 sm:$0xff] }
 0x1e7   :  { %v881_v13 = vadd.f32 %v1577_v28, %v868_v60 }
 0x1e8   :  { %v879_v6 = vadd.f32 %v1577_v28, %v866_v63  ;;  %v880_v9 = vadd.f32 %v1577_v28, %v867_v1  ;;  %v907_v11 = vmul.f32 %v899_v4, %v883_v2  ;;  %v908_v14 = vmul.f32 %v904_v3, %v884_v5  ;;  %v1584_v28 = vld [vmem:[%s2709_s4 + $0x40] sm:$0xff] }
 0x1e9   :  { %v887_v20 = vmax.f32 %v881_v13, 0.0 }
 0x1ea   :  { %v885_v16 = vmax.f32 %v879_v6, 0.0  ;;  %v886_v17 = vmax.f32 %v880_v9, 0.0  ;;  %2004 = vmatmul.mubr.msk.f32.vlgmr.msra.gmra.mxu0 %vm920_vm5, %v907_v11  ;;  %2054 = vmatmul.mubr.msk.f32.vlgmr.msra.gmra.mxu1 %vm920_vm5, %v907_v11 }
 0x1eb   :  { %2013 = vmatpush3.msra.mxu0 %v2570_v7  ;;  %2006 = vmatprep.mubr.msk.f32.mxu0 %vm920_vm5, %v908_v14  ;;  %v1587_v7 = vld [vmem:[%s2709_s4 + $0x58] sm:$0xff]  ;;  %v911_v24 = vmul.f32 %v904_v3, %v887_v20 }
 0x1ec   :  { %v910_v19 = vmul.f32 %v899_v4, %v886_v17  ;;  %2014 = vmatprep.subr.mxu0 %v1590_v15  ;;  %2056 = vmatprep.mubr.msk.f32.mxu1 %vm920_vm5, %v908_v14  ;;  %v909_v21 = vmul.f32 %v894_v45, %v885_v16 }
 0x1ed   :  { %2015 = vmatpush3.msra.mxu0 %v1590_v15 }
 0x1ee   :  { %2016 = vmatprep.subr.mxu0 %v1589_v18  ;;  %2007 = vmatmul.mubr.msk.f32.gmra.mxu0 %vm920_vm5, %v909_v21 }
 0x1ef   :  { %2017 = vmatpush3.msra.mxu0 %v1589_v18  ;;  %2057 = vmatmul.mubr.msk.f32.gmra.mxu1 %vm920_vm5, %v909_v21 }
 0x1f0   :  { %2009 = vmatprep.mubr.msk.f32.mxu0 %vm920_vm5, %v910_v19  ;;  %2018 = vmatprep.subr.mxu0 %v1588_v23 }
 0x1f1   :  { %2059 = vmatprep.mubr.msk.f32.mxu1 %vm920_vm5, %v910_v19  ;;  %2019 = vmatpush3.msra.mxu0 %v1588_v23 }
 0x1f2   :  { %2020 = vmatprep.subr.mxu0 %v1587_v7  ;;  %2010 = vmatmul.mubr.msk.f32.gmra.mxu0 %vm920_vm5, %v911_v24 }
 0x1f3   :  { %2021 = vmatpush3.msra.mxu0 %v1587_v7  ;;  %2060 = vmatmul.mubr.msk.f32.gmra.mxu1 %vm920_vm5, %v911_v24 }
 0x1f4   :  { %2022 = vmatprep.subr.mxu0 %v1586_v25  ;;  %2028 = vmatprep.mubr.msk.f32.mxu0 %vm920_vm5, %v906_v57 }
 0x1f5   :  { %2023 = vmatpush3.msra.mxu0 %v1586_v25 }
 0x1f6   :  { %2024 = vmatprep.subr.mxu0 %v1585_v26 }
 0x1f7   :  { %2025 = vmatpush3.msra.mxu0 %v1585_v26 }
 0x1f8   :  { %2026 = vmatprep.subr.mxu0 %v1584_v28 }
 0x1f9   :  { %2027 = vmatpush3.msra.mxu0 %v1584_v28 }
 0x1fa   :  { %2029 = vmatmul.mubr.msk.f32.vlgmr.msra.gmra.mxu0 %vm920_vm5, %v907_v11  ;;  %2062 = vmatprep.subr.mxu0 %v1338_v30 }
 0x1fb   :  { %2031 = vmatprep.mubr.msk.f32.mxu0 %vm920_vm5, %v908_v14  ;;  %2063 = vmatpush3.msra.mxu0 %v1338_v30 }
 0x1fc   :  { %2064 = vmatprep.subr.mxu0 %v1337_v31 }
 0x1fd   :  { %2065 = vmatpush3.msra.mxu0 %v1337_v31 }
 0x1fe   :  { %2032 = vmatmul.mubr.msk.f32.gmra.mxu0 %vm920_vm5, %v909_v21  ;;  %2066 = vmatprep.subr.mxu0 %v1336_v32 }
 0x1ff   :  { %2034 = vmatprep.mubr.msk.f32.mxu0 %vm920_vm5, %v910_v19  ;;  %2067 = vmatpush3.msra.mxu0 %v1336_v32 }
 0x200   :  { %2068 = vmatprep.subr.mxu0 %v1335_v33 }
 0x201   :  { %2069 = vmatpush3.msra.mxu0 %v1335_v33 }
 0x202   :  { %2035 = vmatmul.mubr.msk.f32.gmra.mxu0 %vm920_vm5, %v911_v24 }
 0x2aa   :  { %v2005_v34 = vpop.f32.mrf.mxu0  ;;  %v2055_v22 = vpop.f32.mrf.mxu1 }
 0x2ab   :  { %v1043_v44 = vrot.slane %v2005_v34, 7  ;;  %v1286_v48 = vrot.slane %v2055_v22, 1 }
 0x2ac   :  { %v1005_v29 = vpop.f32.mrf.mxu0  ;;  %v1250_v35 = vpop.f32.mrf.mxu1 }
 0x2ad   :  { %v1042_v43 = vrot.slane %v1005_v29, 7  ;;  %v1285_v49 = vrot.slane %v1250_v35, 1 }
 0x2ae   :  { %v2008_v36 = vpop.f32.mrf.mxu0 }
 0x2af   :  { %v2058_v37 = vpop.f32.mrf.mxu1  ;;  %v1044_v51 = vsel %vm439_vm2, %v1042_v43, %v1043_v44  ;;  %v1047_v54 = vrot.slane %v2008_v36, 7  ;;  %v1287_v1 = vsel %vm699_vm3, %v1285_v49, %v1286_v48 }
 0x2b0   :  { %v1015_v38 = vpop.f32.mrf.mxu0  ;;  %v1290_v63 = vrot.slane %v2058_v37, 1 }
 0x2b1   :  { %v1260_v40 = vpop.f32.mrf.mxu1  ;;  %v1045_v50 = vrot.slane %v1015_v38, 7 }
 0x2b2   :  { %v2011_v41 = vpop.f32.mrf.mxu0  ;;  %v1288_v39 = vrot.slane %v1260_v40, 1 }
 0x2b3   :  { %v2061_v42 = vpop.f32.mrf.mxu1  ;;  %v1035_v45 = vrot.slane %v2011_v41, 7  ;;  %v1048_v2 = vsel %vm439_vm2, %v1045_v50, %v1047_v54  ;;  %v1046_v13 = vsel %vm439_vm2, %v1043_v44, %v1045_v50 }
 0x2b4   :  { %v1025_v46 = vpop.f32.mrf.mxu0  ;;  %v1289_v57 = vsel %vm699_vm3, %v1286_v48, %v1288_v39  ;;  %v1294_v15 = vrot.slane %v2061_v42, 1  ;;  %v1291_v20 = vsel %vm699_vm3, %v1288_v39, %v1290_v63  ;;  %v1452_v39 = vld [vmem:[%s2713_s8] sm:$0xff] }
 0x2b5   :  { %v1270_v47 = vpop.f32.mrf.mxu1  ;;  %v1058_v60 = vsel %vm439_vm2, %v1035_v45, %v1042_v43  ;;  %v1049_v4 = vrot.slane %v1025_v46, 7 }
 0x2b6   :  { %v1292_v56 = vrot.slane %v1270_v47, 1  ;;  %v1303_v33 = vsel %vm699_vm3, %v1294_v15, %v1285_v49  ;;  %v1454_v47 = vld [vmem:[%s2713_s8 + $0x10] sm:$0xff] }
 0x2b7   :  { %v1051_v25 = vsel %vm439_vm2, %v1049_v4, %v1035_v45  ;;  %v1050_v28 = vsel %vm439_vm2, %v1047_v54, %v1049_v4 }
 0x2b8   :  { %v1293_v11 = vsel %vm699_vm3, %v1290_v63, %v1292_v56  ;;  %v1295_v35 = vsel %vm699_vm3, %v1292_v56, %v1294_v15 }
 0x2ba   :  { %v2030_v52 = vpop.f32.mrf.mxu0 }
 0x2bb   :  { %v1170_v53 = vadd.f32 %v2030_v52, %v1044_v51 }
 0x2bc   :  { %v1140_v27 = vpop.f32.mrf.mxu0 }
 0x2bd   :  { %v1305_v61 = vadd.f32 %v1289_v57, %v1170_v53  ;;  %v1169_v62 = vadd.f32 %v1140_v27, %v1058_v60 }
 0x2be   :  { %v2033_v3 = vpop.f32.mrf.mxu0 }
 0x2bf   :  { %v1318_v5 = vadd.f32 %v1612_v59, %v1305_v61  ;;  %v1304_v6 = vadd.f32 %v1287_v1, %v1169_v62  ;;  %v1172_v9 = vadd.f32 %v2033_v3, %v1048_v2 }
 0x2c0   :  { %v1150_v14 = vpop.f32.mrf.mxu0 }
 0x2c1   :  { %v1317_v16 = vadd.f32 %v1612_v59, %v1304_v6  ;;  %v1307_v17 = vadd.f32 %v1293_v11, %v1172_v9  ;;  %v1171_v18 = vadd.f32 %v1150_v14, %v1046_v13  ;;  %v1324_v19 = vadd.f32 %v1318_v5, %v2337_v58  ;;  %v1619_v14 = vld [vmem:[%s2712_s7] ss:$0 sm:$0xff] }
 0x2c2   :  { %v2036_v21 = vpop.f32.mrf.mxu0 }
 0x2c3   :  { %v1323_v23 = vadd.f32 %v1317_v16, %v2331_v55  ;;  %v1320_v7 = vadd.f32 %v1612_v59, %v1307_v17  ;;  %v1306_v24 = vadd.f32 %v1291_v20, %v1171_v18  ;;  %v1174_v26 = vadd.f32 %v2036_v21, %v1051_v25 }
 0x2c4   :  { %v1160_v30 = vpop.f32.mrf.mxu0  ;;  %v1330_v22 = vmax.f32 %v1324_v19, 0.0 }
 0x2c5   :  { %v1329_v31 = vmax.f32 %v1323_v23, 0.0  ;;  %v1319_v32 = vadd.f32 %v1612_v59, %v1306_v24  ;;  %v1173_v34 = vadd.f32 %v1160_v30, %v1050_v28  ;;  %v1326_v58 = vadd.f32 %v1320_v7, %v2371_v8 }
 0x2c6   :  { %v1309_v29 = vadd.f32 %v1303_v33, %v1174_v26 }
 0x2c7   :  { %v1325_v55 = vadd.f32 %v1319_v32, %v2353_v0  ;;  %v1308_v36 = vadd.f32 %v1295_v35, %v1173_v34  ;;  %2070 = vmatprep.mubr.msk.f32.mxu0 %vm50_vm0, %v1329_v31  ;;  %v1332_v41 = vmax.f32 %v1326_v58, 0.0 }
 0x2c8   :  { %v1322_v37 = vadd.f32 %v1612_v59, %v1309_v29  ;;  %2071 = vmatmul.mubr.msk.f32.vlgmr.msra.gmra.mxu0 %vm50_vm0, %v1330_v22 }
 0x2c9   :  { %v1331_v38 = vmax.f32 %v1325_v55, 0.0  ;;  %v1321_v40 = vadd.f32 %v1612_v59, %v1308_v36 }
 0x2ca   :  { %v1328_v42 = vadd.f32 %v1322_v37, %v2573_v10  ;;  %v1453_v10 = vld [vmem:[%s2713_s8 + $0x8] sm:$0xff] }
 0x2cb   :  { %v1327_v43 = vadd.f32 %v1321_v40, %v2383_v12  ;;  %2073 = vmatprep.mubr.msk.f32.mxu0 %vm50_vm0, %v1331_v38 }
 0x2cc   :  { %2074 = vmatmul.mubr.msk.f32.gmra.mxu0 %vm50_vm0, %v1332_v41  ;;  %v1334_v44 = vmax.f32 %v1328_v42, 0.0 }
 0x2cd   :  { %v1333_v8 = vmax.f32 %v1327_v43, 0.0 }
 0x2cf   :  { %2076 = vmatprep.mubr.msk.f32.mxu0 %vm50_vm0, %v1333_v8 }
 0x2d0   :  { %2077 = vmatmul.mubr.msk.f32.gmra.mxu0 %vm50_vm0, %v1334_v44 }
 0x388   :  { %v2072_v0 = vpop.f32.mrf.mxu0 }
 0x389   :  { %v1456_v48 = vmul.f32 %v2072_v0, %v1453_v10 }
 0x38a   :  { %v1423_v12 = vpop.f32.mrf.mxu0 }
 0x38b   :  { %v1455_v45 = vmul.f32 %v1452_v39, %v1423_v12 }
 0x38c   :  { %v2075_v46 = vpop.f32.mrf.mxu0 }
 0x38d   :  { %v1461_v50 = vadd.f32 %v1456_v48, %v1455_v45  ;;  %v1458_v56 = vmul.f32 %v2075_v46, %v1452_v39 }
 0x38e   :  { %v1433_v49 = vpop.f32.mrf.mxu0 }
 0x38f   :  { %v1457_v51 = vmul.f32 %v1454_v47, %v1433_v49 }
 0x390   :  { %v2078_v52 = vpop.f32.mrf.mxu0 }
 0x391   :  { %v1462_v53 = vadd.f32 %v1461_v50, %v1457_v51  ;;  %v1460_v27 = vmul.f32 %v2078_v52, %v1454_v47 }
 0x392   :  { %v1443_v54 = vpop.f32.mrf.mxu0 }
 0x393   :  { %v1463_v57 = vrot.slane %v1462_v53, 4  ;;  %v1459_v59 = vmul.f32 %v1453_v10, %v1443_v54 }
 0x395   :  { %v1464_v60 = vadd.f32 %v1463_v57, %v1462_v53  ;;  %v1469_v61 = vadd.f32 %v1459_v59, %v1458_v56 }
 0x397   :  { %v1465_v62 = vrot.slane %v1464_v60, 2  ;;  %v1470_v63 = vadd.f32 %v1469_v61, %v1460_v27 }
 0x399   :  { %v1471_v1 = vrot.slane %v1470_v63, 4  ;;  %v1466_v2 = vadd.f32 %v1465_v62, %v1464_v60 }
 0x39b   :  { %v1472_v3 = vadd.f32 %v1471_v1, %v1470_v63  ;;  %v1467_v5 = vrot.slane %v1466_v2, 1 }
 0x39d   :  { %v1473_v4 = vrot.slane %v1472_v3, 2  ;;  %v1468_v11 = vadd.f32 %v1467_v5, %v1466_v2 }
 0x39f   :  { %v1474_v6 = vadd.f32 %v1473_v4, %v1472_v3  ;;  %v1484_v16 = vadd.f32 %v1619_v14, %v1468_v11 }
 0x3a1   :  { %v1475_v9 = vrot.slane %v1474_v6, 1 }
 0x3a3   :  { %v1476_v13 = vadd.f32 %v1475_v9, %v1474_v6 }
 0x3a5   :  { %v1485_v15 = vadd.f32 %v1619_v14, %v1476_v13 }
 0x3a7   :  { %v1488_v17 = vrot.slane %v1485_v15, 7 }
 0x3a9   :  { %v1490_v18 = vsel %vm1489_vm6, %v1488_v17, %v1484_v16 }
 0x3aa   :  { %1492 = vst [vmem:[#allocation2] sm:$0x3] %v1490_v18 }
 0x3ab   :  { %2095 = shalt.err (!%p2092_p4)
}
 0x3ac   :  { %1502 = dma.vmem_to_hbm [thread:$0]  %s1500_s20, 32, %s2715_s10, [#allocation3]  }
 0x3ad   :  { %2104 = dma.done.wait [#allocation3], 32  }
 0x3ae   :  { %2105 = vsyncadd [#allocation3], 4294967264 }
 0x3af   :  { %1506 = vsyncpa [#allocation3], 1 }

</bundles_post_ra>
